<compile_context>
chip_gen: v7x
topology: tpu7x:2x2x1
jax: 0.10.0
libtpu: 0.0.40
codegen_flags: <defaults>
</compile_context>

<pallas_src>
import functools

import jax
import jax.numpy as jnp
import numpy as np
from jax.experimental import pallas as pl
from jax.experimental.pallas import tpu as pltpu


# ----------------------------------------------------------------------------
# Fused Pallas kernel: all GRU layers (wavefront-interleaved) + FC head.
# ----------------------------------------------------------------------------
def _gru_fused_kernel(x_ref, wi0_ref, wh0_ref, bi0_ref, bhn0_ref, *rest,
                      seq_len, batch, hidden_dim, num_layers):
    """Ref layout:
         x_ref    : (T*B, D)      time-major flattened input (row t*B + b)
         wi0_ref  : (D, 3H)       layer-0 input weights  [r | z | n], pre-transposed
         wh0_ref  : (H, 3H)       layer-0 hidden weights [r | z | n], pre-transposed
         bi0_ref  : (1, 3H)       layer-0 biases [b_ir+b_hr | b_iz+b_hz | b_in]
         bhn0_ref : (1, H)        layer-0 b_hn (must stay inside recurrence)
         rest     : per layer l>=1: (W4 (2H,4H), b4 (1,4H));
                    then fc_w_t (H, Dp), fc_b (1, Dp); then out_ref (B, Dp)
    """
    T, B, H = seq_len, batch, hidden_dim
    L = num_layers

    upper_refs = [(rest[2 * i], rest[2 * i + 1]) for i in range(L - 1)]
    fcw_ref = rest[2 * (L - 1)]
    fcb_ref = rest[2 * (L - 1) + 1]
    out_ref = rest[2 * (L - 1) + 2]

    # ---- Hoisted layer-0 input projection: ONE fused batched dot, biases folded.
    gi0 = jnp.dot(x_ref[...], wi0_ref[...],
                  preferred_element_type=jnp.float32) + bi0_ref[...]    # (T*B, 3H)

    # Load weights once; they stay in vregs across the unrolled recurrence.
    wh0 = wh0_ref[...]                                                  # (H, 3H)
    bhn0 = bhn0_ref[...]                                                # (1, H)
    w4 = [w[...] for (w, _) in upper_refs]                              # (2H, 4H)
    b4 = [b[...] for (_, b) in upper_refs]                              # (1, 4H)

    def step_layer0(h, t):
        # One MXU push per step: all three hidden-path gates fused.
        gh = jnp.dot(h, wh0, preferred_element_type=jnp.float32)       # (B, 3H)
        gi = gi0[t * B:(t + 1) * B, :]                                  # static slice
        rz = jax.nn.sigmoid(gi[:, 0:2 * H] + gh[:, 0:2 * H])           # one EUP call
        r = rz[:, 0:H]
        z = rz[:, H:2 * H]
        n = jnp.tanh(gi[:, 2 * H:3 * H] + r * (gh[:, 2 * H:3 * H] + bhn0))
        return (1.0 - z) * n + z * h

    def step_upper(l, h_below, h):
        # One fused (B, 2H) x (2H, 4H) MXU push: [i_r+h_r | i_z+h_z | i_n | h_n].
        xh = jnp.concatenate([h_below, h], axis=1)                      # (B, 2H)
        g = jnp.dot(xh, w4[l - 1], preferred_element_type=jnp.float32) + b4[l - 1]
        rz = jax.nn.sigmoid(g[:, 0:2 * H])                              # one EUP call
        r = rz[:, 0:H]
        z = rz[:, H:2 * H]
        n = jnp.tanh(g[:, 2 * H:3 * H] + r * g[:, 3 * H:4 * H])
        return (1.0 - z) * n + z * h

    # ---- Wavefront-interleaved recurrence -----------------------------------
    # At global step s, layer l processes timestep t = s - l; it needs layer
    # l-1's hidden at step t, which was produced at global step s-1 and is
    # captured by the per-step snapshot h_prev. Two layers' dependency chains
    # are therefore in flight simultaneously.
    h = [jnp.zeros((B, H), jnp.float32) for _ in range(L)]
    for s in range(T + L - 1):
        h_prev = list(h)
        for l in range(L):
            t = s - l
            if 0 <= t < T:
                if l == 0:
                    h[0] = step_layer0(h_prev[0], t)
                else:
                    h[l] = step_upper(l, h_prev[l - 1], h_prev[l])

    # ---- FC head on the final hidden state: lane-dense (padded) store -------
    out_ref[...] = (jnp.dot(h[L - 1], fcw_ref[...],
                            preferred_element_type=jnp.float32)
                    + fcb_ref[...]).astype(out_ref.dtype)


# ----------------------------------------------------------------------------
# Wrapper
# ----------------------------------------------------------------------------
def gru_forward(x, packed, *, pred_len, hidden_dim, num_layers, out_dim):
    """Mirrors GRU.forward: x (B, T, D_in) -> (B, pred_len, D_in)."""
    B, T, D = x.shape
    H = hidden_dim
    d_pad = packed["fc_w_t"].shape[1]

    # time-major rows: row t*B + b corresponds to (batch b, time t)
    x_flat = jnp.transpose(x, (1, 0, 2)).reshape(T * B, D)

    flat_inputs = [x_flat, packed["wi0"], packed["wh0"],
                   packed["bi0"], packed["bhn0"]]
    for (w4, b4) in packed["upper"]:
        flat_inputs += [w4, b4]
    flat_inputs += [packed["fc_w_t"], packed["fc_b"]]

    kernel = functools.partial(_gru_fused_kernel, seq_len=T, batch=B,
                               hidden_dim=H, num_layers=num_layers)

    out_row = pl.pallas_call(
        kernel,
        out_shape=jax.ShapeDtypeStruct((B, d_pad), jnp.float32),
        in_specs=[pl.BlockSpec(memory_space=pltpu.MemorySpace.VMEM)
                  for _ in flat_inputs],
        out_specs=pl.BlockSpec(memory_space=pltpu.MemorySpace.VMEM),
    )(*flat_inputs)

    out_row = out_row[:, :out_dim]
    # h_n[-1].view(B,1,H).repeat(1,pred_len,1) then fc == broadcast of fc output
    return jnp.broadcast_to(out_row[:, None, :], (B, pred_len, out_dim))


# ----------------------------------------------------------------------------
# One-time parameter packing (gate-fused, pre-transposed, biases folded)
# ----------------------------------------------------------------------------
def pack_params(params, hidden_dim, lane=128):
    H = hidden_dim
    packed = {}

    # Layer 0: hoisted input projection + fused hidden-path weights.
    wih0, whh0, bih0, bhh0 = params["gru"][0]
    b_ir, b_iz, b_in = bih0[:H], bih0[H:2 * H], bih0[2 * H:]
    b_hr, b_hz, b_hn = bhh0[:H], bhh0[H:2 * H], bhh0[2 * H:]
    packed["wi0"] = jnp.asarray(wih0.T)                       # (D, 3H)  [r|z|n]
    packed["wh0"] = jnp.asarray(whh0.T)                       # (H, 3H)  [r|z|n]
    packed["bi0"] = jnp.concatenate(
        [b_ir + b_hr, b_iz + b_hz, b_in]).reshape(1, 3 * H)   # exact fold for r,z
    packed["bhn0"] = b_hn.reshape(1, H)                       # scaled by r -> keep

    # Upper layers: single fused (2H, 4H) weight per layer.
    packed["upper"] = []
    for (wih, whh, bih, bhh) in params["gru"][1:]:
        w_ir, w_iz, w_in = wih[:H], wih[H:2 * H], wih[2 * H:]
        w_hr, w_hz, w_hn = whh[:H], whh[H:2 * H], whh[2 * H:]
        zH = jnp.zeros((H, H), jnp.float32)
        top = jnp.concatenate([w_ir.T, w_iz.T, w_in.T, zH], axis=1)   # from h_below
        bot = jnp.concatenate([w_hr.T, w_hz.T, zH, w_hn.T], axis=1)   # from h
        w4 = jnp.concatenate([top, bot], axis=0)                      # (2H, 4H)
        bi_r, bi_z, bi_n = bih[:H], bih[H:2 * H], bih[2 * H:]
        bh_r, bh_z, bh_n = bhh[:H], bhh[H:2 * H], bhh[2 * H:]
        b4 = jnp.concatenate(
            [bi_r + bh_r, bi_z + bh_z, bi_n, bh_n]).reshape(1, 4 * H)
        packed["upper"].append((w4, b4))

    # FC head: pad output lanes to a multiple of 128 -> unmasked lane-dense store.
    d_out = params["fc_w"].shape[0]
    d_pad = max(lane, ((d_out + lane - 1) // lane) * lane)
    fc_w_t = jnp.pad(jnp.asarray(params["fc_w"].T), ((0, 0), (0, d_pad - d_out)))
    fc_b = jnp.pad(params["fc_b"], (0, d_pad - d_out)).reshape(1, d_pad)
    packed["fc_w_t"] = fc_w_t                                  # (H, d_pad)
    packed["fc_b"] = fc_b                                      # (1, d_pad)
    return packed


# ----------------------------------------------------------------------------
# Pure-JAX reference (PyTorch-equivalent math, unpacked params)
# ----------------------------------------------------------------------------
def gru_forward_ref(x, params, *, pred_len, hidden_dim, num_layers):
    B, T, _ = x.shape
    inp = x
    h_last = None
    for layer in range(num_layers):
        wih, whh, bih, bhh = params["gru"][layer]
        H = hidden_dim
        h = jnp.zeros((B, H), jnp.float32)
        ys = []
        for t in range(T):
            gi = inp[:, t] @ wih.T + bih
            gh = h @ whh.T + bhh
            i_r, i_z, i_n = gi[:, :H], gi[:, H:2 * H], gi[:, 2 * H:]
            h_r, h_z, h_n = gh[:, :H], gh[:, H:2 * H], gh[:, 2 * H:]
            r = jax.nn.sigmoid(i_r + h_r)
            z = jax.nn.sigmoid(i_z + h_z)
            n = jnp.tanh(i_n + r * h_n)
            h = (1.0 - z) * n + z * h
            ys.append(h)
        inp = jnp.stack(ys, axis=1)
        h_last = h
    out_row = h_last @ params["fc_w"].T + params["fc_b"]
    return jnp.broadcast_to(out_row[:, None, :], (B, pred_len, out_row.shape[-1]))


# ----------------------------------------------------------------------------
# Deterministic parameter construction (same shapes as the nn.Module)
# ----------------------------------------------------------------------------
def init_params(key, input_dim, hidden_dim, num_layers):
    k = 1.0 / np.sqrt(hidden_dim)
    params = {"gru": []}
    for layer in range(num_layers):
        d_in = input_dim if layer == 0 else hidden_dim
        key, k1, k2, k3, k4 = jax.random.split(key, 5)
        wih = jax.random.uniform(k1, (3 * hidden_dim, d_in), jnp.float32, -k, k)
        whh = jax.random.uniform(k2, (3 * hidden_dim, hidden_dim), jnp.float32, -k, k)
        bih = jax.random.uniform(k3, (3 * hidden_dim,), jnp.float32, -k, k)
        bhh = jax.random.uniform(k4, (3 * hidden_dim,), jnp.float32, -k, k)
        params["gru"].append((wih, whh, bih, bhh))
    key, k5, k6 = jax.random.split(key, 3)
    kf = 1.0 / np.sqrt(hidden_dim)
    params["fc_w"] = jax.random.uniform(k5, (input_dim, hidden_dim), jnp.float32, -kf, kf)
    params["fc_b"] = jax.random.uniform(k6, (input_dim,), jnp.float32, -kf, kf)
    return params


if __name__ == "__main__":
    batch = 2
    seq_len = 8
    pred_len = 4
    input_dim = 4
    hidden_dim = 32
    num_layers = 2

    key = jax.random.PRNGKey(0)
    key, kx, kp = jax.random.split(key, 3)
    x = jax.random.normal(kx, (batch, seq_len, input_dim), jnp.float32)
    params = init_params(kp, input_dim, hidden_dim, num_layers)
    packed = pack_params(params, hidden_dim)

    fwd = jax.jit(functools.partial(gru_forward, pred_len=pred_len,
                                    hidden_dim=hidden_dim,
                                    num_layers=num_layers,
                                    out_dim=input_dim))
    out = jax.block_until_ready(fwd(x, packed))

    ref = jax.block_until_ready(
        gru_forward_ref(x, params, pred_len=pred_len,
                        hidden_dim=hidden_dim, num_layers=num_layers))

    assert out.shape == (batch, pred_len, input_dim), out.shape
    np.testing.assert_allclose(np.asarray(out), np.asarray(ref),
                               rtol=1e-3, atol=1e-3)
    print("KERNEL_OK")
</pallas_src>

<mosaic_0001>
module attributes {stable_mosaic.version = 11 : i64} {
  func.func @_gru_fused_kernel(%arg0: memref<16x4xf32, #tpu.memory_space<vmem>>, %arg1: memref<4x96xf32, #tpu.memory_space<vmem>>, %arg2: memref<32x96xf32, #tpu.memory_space<vmem>>, %arg3: memref<1x96xf32, #tpu.memory_space<vmem>>, %arg4: memref<1x32xf32, #tpu.memory_space<vmem>>, %arg5: memref<64x128xf32, #tpu.memory_space<vmem>>, %arg6: memref<1x128xf32, #tpu.memory_space<vmem>>, %arg7: memref<32x128xf32, #tpu.memory_space<vmem>>, %arg8: memref<1x128xf32, #tpu.memory_space<vmem>>, %arg9: memref<2x128xf32, #tpu.memory_space<vmem>>) attributes {dimension_semantics = [], scalar_prefetch = 0 : i64, scratch_operands = 0 : i64, tpu.core_type = #tpu.core_type<tc>} {
    %c0 = arith.constant 0 : index
    %c0_0 = arith.constant 0 : index
    %0 = vector.load %arg0[%c0, %c0_0] : memref<16x4xf32, #tpu.memory_space<vmem>>, vector<16x4xf32>
    %c0_1 = arith.constant 0 : index
    %c0_2 = arith.constant 0 : index
    %1 = vector.load %arg1[%c0_1, %c0_2] : memref<4x96xf32, #tpu.memory_space<vmem>>, vector<4x96xf32>
    %cst = arith.constant dense<0.000000e+00> : vector<16x96xf32>
    %2 = tpu.matmul %0, %1, %cst {dimension_numbers = #tpu.dot_dimension_numbers<[1], [0], [0], [1], [0, 0, 1, 1], [], []>} : vector<16x4xf32>, vector<4x96xf32>, vector<16x96xf32> -> vector<16x96xf32>
    %c0_3 = arith.constant 0 : index
    %c0_4 = arith.constant 0 : index
    %3 = vector.load %arg3[%c0_3, %c0_4] : memref<1x96xf32, #tpu.memory_space<vmem>>, vector<1x96xf32>
    %4 = vector.broadcast %3 : vector<1x96xf32> to vector<16x96xf32>
    %5 = arith.addf %2, %4 : vector<16x96xf32>
    %c0_5 = arith.constant 0 : index
    %c0_6 = arith.constant 0 : index
    %6 = vector.load %arg2[%c0_5, %c0_6] : memref<32x96xf32, #tpu.memory_space<vmem>>, vector<32x96xf32>
    %c0_7 = arith.constant 0 : index
    %c0_8 = arith.constant 0 : index
    %7 = vector.load %arg4[%c0_7, %c0_8] : memref<1x32xf32, #tpu.memory_space<vmem>>, vector<1x32xf32>
    %c0_9 = arith.constant 0 : index
    %c0_10 = arith.constant 0 : index
    %8 = vector.load %arg5[%c0_9, %c0_10] : memref<64x128xf32, #tpu.memory_space<vmem>>, vector<64x128xf32>
    %c0_11 = arith.constant 0 : index
    %c0_12 = arith.constant 0 : index
    %9 = vector.load %arg6[%c0_11, %c0_12] : memref<1x128xf32, #tpu.memory_space<vmem>>, vector<1x128xf32>
    %cst_13 = arith.constant 0.000000e+00 : f32
    %10 = vector.broadcast %cst_13 : f32 to vector<2x32xf32>
    %cst_14 = arith.constant 0.000000e+00 : f32
    %11 = vector.broadcast %cst_14 : f32 to vector<2x32xf32>
    %cst_15 = arith.constant dense<0.000000e+00> : vector<2x96xf32>
    %12 = tpu.matmul %10, %6, %cst_15 {dimension_numbers = #tpu.dot_dimension_numbers<[1], [0], [0], [1], [0, 0, 1, 1], [], []>} : vector<2x32xf32>, vector<32x96xf32>, vector<2x96xf32> -> vector<2x96xf32>
    %13 = vector.extract_strided_slice %5 {offsets = [0, 0], sizes = [2, 96], strides = [1, 1]} : vector<16x96xf32> to vector<2x96xf32>
    %14 = vector.extract_strided_slice %13 {offsets = [0, 0], sizes = [2, 64], strides = [1, 1]} : vector<2x96xf32> to vector<2x64xf32>
    %15 = vector.extract_strided_slice %12 {offsets = [0, 0], sizes = [2, 64], strides = [1, 1]} : vector<2x96xf32> to vector<2x64xf32>
    %16 = arith.addf %14, %15 : vector<2x64xf32>
    %17 = arith.negf %16 : vector<2x64xf32>
    %18 = math.exp %17 : vector<2x64xf32>
    %cst_16 = arith.constant 1.000000e+00 : f32
    %19 = vector.broadcast %cst_16 : f32 to vector<2x64xf32>
    %20 = arith.addf %19, %18 : vector<2x64xf32>
    %21 = arith.divf %19, %20 : vector<2x64xf32>
    %22 = vector.extract_strided_slice %21 {offsets = [0, 0], sizes = [2, 32], strides = [1, 1]} : vector<2x64xf32> to vector<2x32xf32>
    %23 = vector.extract_strided_slice %21 {offsets = [0, 32], sizes = [2, 32], strides = [1, 1]} : vector<2x64xf32> to vector<2x32xf32>
    %24 = vector.extract_strided_slice %13 {offsets = [0, 64], sizes = [2, 32], strides = [1, 1]} : vector<2x96xf32> to vector<2x32xf32>
    %25 = vector.extract_strided_slice %12 {offsets = [0, 64], sizes = [2, 32], strides = [1, 1]} : vector<2x96xf32> to vector<2x32xf32>
    %26 = vector.broadcast %7 : vector<1x32xf32> to vector<2x32xf32>
    %27 = arith.addf %25, %26 : vector<2x32xf32>
    %28 = arith.mulf %22, %27 : vector<2x32xf32>
    %29 = arith.addf %24, %28 : vector<2x32xf32>
    %30 = math.tanh %29 : vector<2x32xf32>
    %cst_17 = arith.constant 1.000000e+00 : f32
    %31 = vector.broadcast %cst_17 : f32 to vector<2x32xf32>
    %32 = arith.subf %31, %23 : vector<2x32xf32>
    %33 = arith.mulf %32, %30 : vector<2x32xf32>
    %34 = arith.mulf %23, %10 : vector<2x32xf32>
    %35 = arith.addf %33, %34 : vector<2x32xf32>
    %cst_18 = arith.constant dense<0.000000e+00> : vector<2x96xf32>
    %36 = tpu.matmul %35, %6, %cst_18 {dimension_numbers = #tpu.dot_dimension_numbers<[1], [0], [0], [1], [0, 0, 1, 1], [], []>} : vector<2x32xf32>, vector<32x96xf32>, vector<2x96xf32> -> vector<2x96xf32>
    %37 = vector.extract_strided_slice %5 {offsets = [2, 0], sizes = [2, 96], strides = [1, 1]} : vector<16x96xf32> to vector<2x96xf32>
    %38 = vector.extract_strided_slice %37 {offsets = [0, 0], sizes = [2, 64], strides = [1, 1]} : vector<2x96xf32> to vector<2x64xf32>
    %39 = vector.extract_strided_slice %36 {offsets = [0, 0], sizes = [2, 64], strides = [1, 1]} : vector<2x96xf32> to vector<2x64xf32>
    %40 = arith.addf %38, %39 : vector<2x64xf32>
    %41 = arith.negf %40 : vector<2x64xf32>
    %42 = math.exp %41 : vector<2x64xf32>
    %cst_19 = arith.constant 1.000000e+00 : f32
    %43 = vector.broadcast %cst_19 : f32 to vector<2x64xf32>
    %44 = arith.addf %43, %42 : vector<2x64xf32>
    %45 = arith.divf %43, %44 : vector<2x64xf32>
    %46 = vector.extract_strided_slice %45 {offsets = [0, 0], sizes = [2, 32], strides = [1, 1]} : vector<2x64xf32> to vector<2x32xf32>
    %47 = vector.extract_strided_slice %45 {offsets = [0, 32], sizes = [2, 32], strides = [1, 1]} : vector<2x64xf32> to vector<2x32xf32>
    %48 = vector.extract_strided_slice %37 {offsets = [0, 64], sizes = [2, 32], strides = [1, 1]} : vector<2x96xf32> to vector<2x32xf32>
    %49 = vector.extract_strided_slice %36 {offsets = [0, 64], sizes = [2, 32], strides = [1, 1]} : vector<2x96xf32> to vector<2x32xf32>
    %50 = vector.broadcast %7 : vector<1x32xf32> to vector<2x32xf32>
    %51 = arith.addf %49, %50 : vector<2x32xf32>
    %52 = arith.mulf %46, %51 : vector<2x32xf32>
    %53 = arith.addf %48, %52 : vector<2x32xf32>
    %54 = math.tanh %53 : vector<2x32xf32>
    %cst_20 = arith.constant 1.000000e+00 : f32
    %55 = vector.broadcast %cst_20 : f32 to vector<2x32xf32>
    %56 = arith.subf %55, %47 : vector<2x32xf32>
    %57 = arith.mulf %56, %54 : vector<2x32xf32>
    %58 = arith.mulf %47, %35 : vector<2x32xf32>
    %59 = arith.addf %57, %58 : vector<2x32xf32>
    %60 = tpu.concatenate %35, %11 in 1 : vector<2x32xf32>, vector<2x32xf32> -> vector<2x64xf32>
    %cst_21 = arith.constant dense<0.000000e+00> : vector<2x128xf32>
    %61 = tpu.matmul %60, %8, %cst_21 {dimension_numbers = #tpu.dot_dimension_numbers<[1], [0], [0], [1], [0, 0, 1, 1], [], []>} : vector<2x64xf32>, vector<64x128xf32>, vector<2x128xf32> -> vector<2x128xf32>
    %62 = vector.broadcast %9 : vector<1x128xf32> to vector<2x128xf32>
    %63 = arith.addf %61, %62 : vector<2x128xf32>
    %64 = vector.extract_strided_slice %63 {offsets = [0, 0], sizes = [2, 64], strides = [1, 1]} : vector<2x128xf32> to vector<2x64xf32>
    %65 = arith.negf %64 : vector<2x64xf32>
    %66 = math.exp %65 : vector<2x64xf32>
    %cst_22 = arith.constant 1.000000e+00 : f32
    %67 = vector.broadcast %cst_22 : f32 to vector<2x64xf32>
    %68 = arith.addf %67, %66 : vector<2x64xf32>
    %69 = arith.divf %67, %68 : vector<2x64xf32>
    %70 = vector.extract_strided_slice %69 {offsets = [0, 0], sizes = [2, 32], strides = [1, 1]} : vector<2x64xf32> to vector<2x32xf32>
    %71 = vector.extract_strided_slice %69 {offsets = [0, 32], sizes = [2, 32], strides = [1, 1]} : vector<2x64xf32> to vector<2x32xf32>
    %72 = vector.extract_strided_slice %63 {offsets = [0, 64], sizes = [2, 32], strides = [1, 1]} : vector<2x128xf32> to vector<2x32xf32>
    %73 = vector.extract_strided_slice %63 {offsets = [0, 96], sizes = [2, 32], strides = [1, 1]} : vector<2x128xf32> to vector<2x32xf32>
    %74 = arith.mulf %70, %73 : vector<2x32xf32>
    %75 = arith.addf %72, %74 : vector<2x32xf32>
    %76 = math.tanh %75 : vector<2x32xf32>
    %cst_23 = arith.constant 1.000000e+00 : f32
    %77 = vector.broadcast %cst_23 : f32 to vector<2x32xf32>
    %78 = arith.subf %77, %71 : vector<2x32xf32>
    %79 = arith.mulf %78, %76 : vector<2x32xf32>
    %80 = arith.mulf %71, %11 : vector<2x32xf32>
    %81 = arith.addf %79, %80 : vector<2x32xf32>
    %cst_24 = arith.constant dense<0.000000e+00> : vector<2x96xf32>
    %82 = tpu.matmul %59, %6, %cst_24 {dimension_numbers = #tpu.dot_dimension_numbers<[1], [0], [0], [1], [0, 0, 1, 1], [], []>} : vector<2x32xf32>, vector<32x96xf32>, vector<2x96xf32> -> vector<2x96xf32>
    %83 = vector.extract_strided_slice %5 {offsets = [4, 0], sizes = [2, 96], strides = [1, 1]} : vector<16x96xf32> to vector<2x96xf32>
    %84 = vector.extract_strided_slice %83 {offsets = [0, 0], sizes = [2, 64], strides = [1, 1]} : vector<2x96xf32> to vector<2x64xf32>
    %85 = vector.extract_strided_slice %82 {offsets = [0, 0], sizes = [2, 64], strides = [1, 1]} : vector<2x96xf32> to vector<2x64xf32>
    %86 = arith.addf %84, %85 : vector<2x64xf32>
    %87 = arith.negf %86 : vector<2x64xf32>
    %88 = math.exp %87 : vector<2x64xf32>
    %cst_25 = arith.constant 1.000000e+00 : f32
    %89 = vector.broadcast %cst_25 : f32 to vector<2x64xf32>
    %90 = arith.addf %89, %88 : vector<2x64xf32>
    %91 = arith.divf %89, %90 : vector<2x64xf32>
    %92 = vector.extract_strided_slice %91 {offsets = [0, 0], sizes = [2, 32], strides = [1, 1]} : vector<2x64xf32> to vector<2x32xf32>
    %93 = vector.extract_strided_slice %91 {offsets = [0, 32], sizes = [2, 32], strides = [1, 1]} : vector<2x64xf32> to vector<2x32xf32>
    %94 = vector.extract_strided_slice %83 {offsets = [0, 64], sizes = [2, 32], strides = [1, 1]} : vector<2x96xf32> to vector<2x32xf32>
    %95 = vector.extract_strided_slice %82 {offsets = [0, 64], sizes = [2, 32], strides = [1, 1]} : vector<2x96xf32> to vector<2x32xf32>
    %96 = vector.broadcast %7 : vector<1x32xf32> to vector<2x32xf32>
    %97 = arith.addf %95, %96 : vector<2x32xf32>
    %98 = arith.mulf %92, %97 : vector<2x32xf32>
    %99 = arith.addf %94, %98 : vector<2x32xf32>
    %100 = math.tanh %99 : vector<2x32xf32>
    %cst_26 = arith.constant 1.000000e+00 : f32
    %101 = vector.broadcast %cst_26 : f32 to vector<2x32xf32>
    %102 = arith.subf %101, %93 : vector<2x32xf32>
    %103 = arith.mulf %102, %100 : vector<2x32xf32>
    %104 = arith.mulf %93, %59 : vector<2x32xf32>
    %105 = arith.addf %103, %104 : vector<2x32xf32>
    %106 = tpu.concatenate %59, %81 in 1 : vector<2x32xf32>, vector<2x32xf32> -> vector<2x64xf32>
    %cst_27 = arith.constant dense<0.000000e+00> : vector<2x128xf32>
    %107 = tpu.matmul %106, %8, %cst_27 {dimension_numbers = #tpu.dot_dimension_numbers<[1], [0], [0], [1], [0, 0, 1, 1], [], []>} : vector<2x64xf32>, vector<64x128xf32>, vector<2x128xf32> -> vector<2x128xf32>
    %108 = vector.broadcast %9 : vector<1x128xf32> to vector<2x128xf32>
    %109 = arith.addf %107, %108 : vector<2x128xf32>
    %110 = vector.extract_strided_slice %109 {offsets = [0, 0], sizes = [2, 64], strides = [1, 1]} : vector<2x128xf32> to vector<2x64xf32>
    %111 = arith.negf %110 : vector<2x64xf32>
    %112 = math.exp %111 : vector<2x64xf32>
    %cst_28 = arith.constant 1.000000e+00 : f32
    %113 = vector.broadcast %cst_28 : f32 to vector<2x64xf32>
    %114 = arith.addf %113, %112 : vector<2x64xf32>
    %115 = arith.divf %113, %114 : vector<2x64xf32>
    %116 = vector.extract_strided_slice %115 {offsets = [0, 0], sizes = [2, 32], strides = [1, 1]} : vector<2x64xf32> to vector<2x32xf32>
    %117 = vector.extract_strided_slice %115 {offsets = [0, 32], sizes = [2, 32], strides = [1, 1]} : vector<2x64xf32> to vector<2x32xf32>
    %118 = vector.extract_strided_slice %109 {offsets = [0, 64], sizes = [2, 32], strides = [1, 1]} : vector<2x128xf32> to vector<2x32xf32>
    %119 = vector.extract_strided_slice %109 {offsets = [0, 96], sizes = [2, 32], strides = [1, 1]} : vector<2x128xf32> to vector<2x32xf32>
    %120 = arith.mulf %116, %119 : vector<2x32xf32>
    %121 = arith.addf %118, %120 : vector<2x32xf32>
    %122 = math.tanh %121 : vector<2x32xf32>
    %cst_29 = arith.constant 1.000000e+00 : f32
    %123 = vector.broadcast %cst_29 : f32 to vector<2x32xf32>
    %124 = arith.subf %123, %117 : vector<2x32xf32>
    %125 = arith.mulf %124, %122 : vector<2x32xf32>
    %126 = arith.mulf %117, %81 : vector<2x32xf32>
    %127 = arith.addf %125, %126 : vector<2x32xf32>
    %cst_30 = arith.constant dense<0.000000e+00> : vector<2x96xf32>
    %128 = tpu.matmul %105, %6, %cst_30 {dimension_numbers = #tpu.dot_dimension_numbers<[1], [0], [0], [1], [0, 0, 1, 1], [], []>} : vector<2x32xf32>, vector<32x96xf32>, vector<2x96xf32> -> vector<2x96xf32>
    %129 = vector.extract_strided_slice %5 {offsets = [6, 0], sizes = [2, 96], strides = [1, 1]} : vector<16x96xf32> to vector<2x96xf32>
    %130 = vector.extract_strided_slice %129 {offsets = [0, 0], sizes = [2, 64], strides = [1, 1]} : vector<2x96xf32> to vector<2x64xf32>
    %131 = vector.extract_strided_slice %128 {offsets = [0, 0], sizes = [2, 64], strides = [1, 1]} : vector<2x96xf32> to vector<2x64xf32>
    %132 = arith.addf %130, %131 : vector<2x64xf32>
    %133 = arith.negf %132 : vector<2x64xf32>
    %134 = math.exp %133 : vector<2x64xf32>
    %cst_31 = arith.constant 1.000000e+00 : f32
    %135 = vector.broadcast %cst_31 : f32 to vector<2x64xf32>
    %136 = arith.addf %135, %134 : vector<2x64xf32>
    %137 = arith.divf %135, %136 : vector<2x64xf32>
    %138 = vector.extract_strided_slice %137 {offsets = [0, 0], sizes = [2, 32], strides = [1, 1]} : vector<2x64xf32> to vector<2x32xf32>
    %139 = vector.extract_strided_slice %137 {offsets = [0, 32], sizes = [2, 32], strides = [1, 1]} : vector<2x64xf32> to vector<2x32xf32>
    %140 = vector.extract_strided_slice %129 {offsets = [0, 64], sizes = [2, 32], strides = [1, 1]} : vector<2x96xf32> to vector<2x32xf32>
    %141 = vector.extract_strided_slice %128 {offsets = [0, 64], sizes = [2, 32], strides = [1, 1]} : vector<2x96xf32> to vector<2x32xf32>
    %142 = vector.broadcast %7 : vector<1x32xf32> to vector<2x32xf32>
    %143 = arith.addf %141, %142 : vector<2x32xf32>
    %144 = arith.mulf %138, %143 : vector<2x32xf32>
    %145 = arith.addf %140, %144 : vector<2x32xf32>
    %146 = math.tanh %145 : vector<2x32xf32>
    %cst_32 = arith.constant 1.000000e+00 : f32
    %147 = vector.broadcast %cst_32 : f32 to vector<2x32xf32>
    %148 = arith.subf %147, %139 : vector<2x32xf32>
    %149 = arith.mulf %148, %146 : vector<2x32xf32>
    %150 = arith.mulf %139, %105 : vector<2x32xf32>
    %151 = arith.addf %149, %150 : vector<2x32xf32>
    %152 = tpu.concatenate %105, %127 in 1 : vector<2x32xf32>, vector<2x32xf32> -> vector<2x64xf32>
    %cst_33 = arith.constant dense<0.000000e+00> : vector<2x128xf32>
    %153 = tpu.matmul %152, %8, %cst_33 {dimension_numbers = #tpu.dot_dimension_numbers<[1], [0], [0], [1], [0, 0, 1, 1], [], []>} : vector<2x64xf32>, vector<64x128xf32>, vector<2x128xf32> -> vector<2x128xf32>
    %154 = vector.broadcast %9 : vector<1x128xf32> to vector<2x128xf32>
    %155 = arith.addf %153, %154 : vector<2x128xf32>
    %156 = vector.extract_strided_slice %155 {offsets = [0, 0], sizes = [2, 64], strides = [1, 1]} : vector<2x128xf32> to vector<2x64xf32>
    %157 = arith.negf %156 : vector<2x64xf32>
    %158 = math.exp %157 : vector<2x64xf32>
    %cst_34 = arith.constant 1.000000e+00 : f32
    %159 = vector.broadcast %cst_34 : f32 to vector<2x64xf32>
    %160 = arith.addf %159, %158 : vector<2x64xf32>
    %161 = arith.divf %159, %160 : vector<2x64xf32>
    %162 = vector.extract_strided_slice %161 {offsets = [0, 0], sizes = [2, 32], strides = [1, 1]} : vector<2x64xf32> to vector<2x32xf32>
    %163 = vector.extract_strided_slice %161 {offsets = [0, 32], sizes = [2, 32], strides = [1, 1]} : vector<2x64xf32> to vector<2x32xf32>
    %164 = vector.extract_strided_slice %155 {offsets = [0, 64], sizes = [2, 32], strides = [1, 1]} : vector<2x128xf32> to vector<2x32xf32>
    %165 = vector.extract_strided_slice %155 {offsets = [0, 96], sizes = [2, 32], strides = [1, 1]} : vector<2x128xf32> to vector<2x32xf32>
    %166 = arith.mulf %162, %165 : vector<2x32xf32>
    %167 = arith.addf %164, %166 : vector<2x32xf32>
    %168 = math.tanh %167 : vector<2x32xf32>
    %cst_35 = arith.constant 1.000000e+00 : f32
    %169 = vector.broadcast %cst_35 : f32 to vector<2x32xf32>
    %170 = arith.subf %169, %163 : vector<2x32xf32>
    %171 = arith.mulf %170, %168 : vector<2x32xf32>
    %172 = arith.mulf %163, %127 : vector<2x32xf32>
    %173 = arith.addf %171, %172 : vector<2x32xf32>
    %cst_36 = arith.constant dense<0.000000e+00> : vector<2x96xf32>
    %174 = tpu.matmul %151, %6, %cst_36 {dimension_numbers = #tpu.dot_dimension_numbers<[1], [0], [0], [1], [0, 0, 1, 1], [], []>} : vector<2x32xf32>, vector<32x96xf32>, vector<2x96xf32> -> vector<2x96xf32>
    %175 = vector.extract_strided_slice %5 {offsets = [8, 0], sizes = [2, 96], strides = [1, 1]} : vector<16x96xf32> to vector<2x96xf32>
    %176 = vector.extract_strided_slice %175 {offsets = [0, 0], sizes = [2, 64], strides = [1, 1]} : vector<2x96xf32> to vector<2x64xf32>
    %177 = vector.extract_strided_slice %174 {offsets = [0, 0], sizes = [2, 64], strides = [1, 1]} : vector<2x96xf32> to vector<2x64xf32>
    %178 = arith.addf %176, %177 : vector<2x64xf32>
    %179 = arith.negf %178 : vector<2x64xf32>
    %180 = math.exp %179 : vector<2x64xf32>
    %cst_37 = arith.constant 1.000000e+00 : f32
    %181 = vector.broadcast %cst_37 : f32 to vector<2x64xf32>
    %182 = arith.addf %181, %180 : vector<2x64xf32>
    %183 = arith.divf %181, %182 : vector<2x64xf32>
    %184 = vector.extract_strided_slice %183 {offsets = [0, 0], sizes = [2, 32], strides = [1, 1]} : vector<2x64xf32> to vector<2x32xf32>
    %185 = vector.extract_strided_slice %183 {offsets = [0, 32], sizes = [2, 32], strides = [1, 1]} : vector<2x64xf32> to vector<2x32xf32>
    %186 = vector.extract_strided_slice %175 {offsets = [0, 64], sizes = [2, 32], strides = [1, 1]} : vector<2x96xf32> to vector<2x32xf32>
    %187 = vector.extract_strided_slice %174 {offsets = [0, 64], sizes = [2, 32], strides = [1, 1]} : vector<2x96xf32> to vector<2x32xf32>
    %188 = vector.broadcast %7 : vector<1x32xf32> to vector<2x32xf32>
    %189 = arith.addf %187, %188 : vector<2x32xf32>
    %190 = arith.mulf %184, %189 : vector<2x32xf32>
    %191 = arith.addf %186, %190 : vector<2x32xf32>
    %192 = math.tanh %191 : vector<2x32xf32>
    %cst_38 = arith.constant 1.000000e+00 : f32
    %193 = vector.broadcast %cst_38 : f32 to vector<2x32xf32>
    %194 = arith.subf %193, %185 : vector<2x32xf32>
    %195 = arith.mulf %194, %192 : vector<2x32xf32>
    %196 = arith.mulf %185, %151 : vector<2x32xf32>
    %197 = arith.addf %195, %196 : vector<2x32xf32>
    %198 = tpu.concatenate %151, %173 in 1 : vector<2x32xf32>, vector<2x32xf32> -> vector<2x64xf32>
    %cst_39 = arith.constant dense<0.000000e+00> : vector<2x128xf32>
    %199 = tpu.matmul %198, %8, %cst_39 {dimension_numbers = #tpu.dot_dimension_numbers<[1], [0], [0], [1], [0, 0, 1, 1], [], []>} : vector<2x64xf32>, vector<64x128xf32>, vector<2x128xf32> -> vector<2x128xf32>
    %200 = vector.broadcast %9 : vector<1x128xf32> to vector<2x128xf32>
    %201 = arith.addf %199, %200 : vector<2x128xf32>
    %202 = vector.extract_strided_slice %201 {offsets = [0, 0], sizes = [2, 64], strides = [1, 1]} : vector<2x128xf32> to vector<2x64xf32>
    %203 = arith.negf %202 : vector<2x64xf32>
    %204 = math.exp %203 : vector<2x64xf32>
    %cst_40 = arith.constant 1.000000e+00 : f32
    %205 = vector.broadcast %cst_40 : f32 to vector<2x64xf32>
    %206 = arith.addf %205, %204 : vector<2x64xf32>
    %207 = arith.divf %205, %206 : vector<2x64xf32>
    %208 = vector.extract_strided_slice %207 {offsets = [0, 0], sizes = [2, 32], strides = [1, 1]} : vector<2x64xf32> to vector<2x32xf32>
    %209 = vector.extract_strided_slice %207 {offsets = [0, 32], sizes = [2, 32], strides = [1, 1]} : vector<2x64xf32> to vector<2x32xf32>
    %210 = vector.extract_strided_slice %201 {offsets = [0, 64], sizes = [2, 32], strides = [1, 1]} : vector<2x128xf32> to vector<2x32xf32>
    %211 = vector.extract_strided_slice %201 {offsets = [0, 96], sizes = [2, 32], strides = [1, 1]} : vector<2x128xf32> to vector<2x32xf32>
    %212 = arith.mulf %208, %211 : vector<2x32xf32>
    %213 = arith.addf %210, %212 : vector<2x32xf32>
    %214 = math.tanh %213 : vector<2x32xf32>
    %cst_41 = arith.constant 1.000000e+00 : f32
    %215 = vector.broadcast %cst_41 : f32 to vector<2x32xf32>
    %216 = arith.subf %215, %209 : vector<2x32xf32>
    %217 = arith.mulf %216, %214 : vector<2x32xf32>
    %218 = arith.mulf %209, %173 : vector<2x32xf32>
    %219 = arith.addf %217, %218 : vector<2x32xf32>
    %cst_42 = arith.constant dense<0.000000e+00> : vector<2x96xf32>
    %220 = tpu.matmul %197, %6, %cst_42 {dimension_numbers = #tpu.dot_dimension_numbers<[1], [0], [0], [1], [0, 0, 1, 1], [], []>} : vector<2x32xf32>, vector<32x96xf32>, vector<2x96xf32> -> vector<2x96xf32>
    %221 = vector.extract_strided_slice %5 {offsets = [10, 0], sizes = [2, 96], strides = [1, 1]} : vector<16x96xf32> to vector<2x96xf32>
    %222 = vector.extract_strided_slice %221 {offsets = [0, 0], sizes = [2, 64], strides = [1, 1]} : vector<2x96xf32> to vector<2x64xf32>
    %223 = vector.extract_strided_slice %220 {offsets = [0, 0], sizes = [2, 64], strides = [1, 1]} : vector<2x96xf32> to vector<2x64xf32>
    %224 = arith.addf %222, %223 : vector<2x64xf32>
    %225 = arith.negf %224 : vector<2x64xf32>
    %226 = math.exp %225 : vector<2x64xf32>
    %cst_43 = arith.constant 1.000000e+00 : f32
    %227 = vector.broadcast %cst_43 : f32 to vector<2x64xf32>
    %228 = arith.addf %227, %226 : vector<2x64xf32>
    %229 = arith.divf %227, %228 : vector<2x64xf32>
    %230 = vector.extract_strided_slice %229 {offsets = [0, 0], sizes = [2, 32], strides = [1, 1]} : vector<2x64xf32> to vector<2x32xf32>
    %231 = vector.extract_strided_slice %229 {offsets = [0, 32], sizes = [2, 32], strides = [1, 1]} : vector<2x64xf32> to vector<2x32xf32>
    %232 = vector.extract_strided_slice %221 {offsets = [0, 64], sizes = [2, 32], strides = [1, 1]} : vector<2x96xf32> to vector<2x32xf32>
    %233 = vector.extract_strided_slice %220 {offsets = [0, 64], sizes = [2, 32], strides = [1, 1]} : vector<2x96xf32> to vector<2x32xf32>
    %234 = vector.broadcast %7 : vector<1x32xf32> to vector<2x32xf32>
    %235 = arith.addf %233, %234 : vector<2x32xf32>
    %236 = arith.mulf %230, %235 : vector<2x32xf32>
    %237 = arith.addf %232, %236 : vector<2x32xf32>
    %238 = math.tanh %237 : vector<2x32xf32>
    %cst_44 = arith.constant 1.000000e+00 : f32
    %239 = vector.broadcast %cst_44 : f32 to vector<2x32xf32>
    %240 = arith.subf %239, %231 : vector<2x32xf32>
    %241 = arith.mulf %240, %238 : vector<2x32xf32>
    %242 = arith.mulf %231, %197 : vector<2x32xf32>
    %243 = arith.addf %241, %242 : vector<2x32xf32>
    %244 = tpu.concatenate %197, %219 in 1 : vector<2x32xf32>, vector<2x32xf32> -> vector<2x64xf32>
    %cst_45 = arith.constant dense<0.000000e+00> : vector<2x128xf32>
    %245 = tpu.matmul %244, %8, %cst_45 {dimension_numbers = #tpu.dot_dimension_numbers<[1], [0], [0], [1], [0, 0, 1, 1], [], []>} : vector<2x64xf32>, vector<64x128xf32>, vector<2x128xf32> -> vector<2x128xf32>
    %246 = vector.broadcast %9 : vector<1x128xf32> to vector<2x128xf32>
    %247 = arith.addf %245, %246 : vector<2x128xf32>
    %248 = vector.extract_strided_slice %247 {offsets = [0, 0], sizes = [2, 64], strides = [1, 1]} : vector<2x128xf32> to vector<2x64xf32>
    %249 = arith.negf %248 : vector<2x64xf32>
    %250 = math.exp %249 : vector<2x64xf32>
    %cst_46 = arith.constant 1.000000e+00 : f32
    %251 = vector.broadcast %cst_46 : f32 to vector<2x64xf32>
    %252 = arith.addf %251, %250 : vector<2x64xf32>
    %253 = arith.divf %251, %252 : vector<2x64xf32>
    %254 = vector.extract_strided_slice %253 {offsets = [0, 0], sizes = [2, 32], strides = [1, 1]} : vector<2x64xf32> to vector<2x32xf32>
    %255 = vector.extract_strided_slice %253 {offsets = [0, 32], sizes = [2, 32], strides = [1, 1]} : vector<2x64xf32> to vector<2x32xf32>
    %256 = vector.extract_strided_slice %247 {offsets = [0, 64], sizes = [2, 32], strides = [1, 1]} : vector<2x128xf32> to vector<2x32xf32>
    %257 = vector.extract_strided_slice %247 {offsets = [0, 96], sizes = [2, 32], strides = [1, 1]} : vector<2x128xf32> to vector<2x32xf32>
    %258 = arith.mulf %254, %257 : vector<2x32xf32>
    %259 = arith.addf %256, %258 : vector<2x32xf32>
    %260 = math.tanh %259 : vector<2x32xf32>
    %cst_47 = arith.constant 1.000000e+00 : f32
    %261 = vector.broadcast %cst_47 : f32 to vector<2x32xf32>
    %262 = arith.subf %261, %255 : vector<2x32xf32>
    %263 = arith.mulf %262, %260 : vector<2x32xf32>
    %264 = arith.mulf %255, %219 : vector<2x32xf32>
    %265 = arith.addf %263, %264 : vector<2x32xf32>
    %cst_48 = arith.constant dense<0.000000e+00> : vector<2x96xf32>
    %266 = tpu.matmul %243, %6, %cst_48 {dimension_numbers = #tpu.dot_dimension_numbers<[1], [0], [0], [1], [0, 0, 1, 1], [], []>} : vector<2x32xf32>, vector<32x96xf32>, vector<2x96xf32> -> vector<2x96xf32>
    %267 = vector.extract_strided_slice %5 {offsets = [12, 0], sizes = [2, 96], strides = [1, 1]} : vector<16x96xf32> to vector<2x96xf32>
    %268 = vector.extract_strided_slice %267 {offsets = [0, 0], sizes = [2, 64], strides = [1, 1]} : vector<2x96xf32> to vector<2x64xf32>
    %269 = vector.extract_strided_slice %266 {offsets = [0, 0], sizes = [2, 64], strides = [1, 1]} : vector<2x96xf32> to vector<2x64xf32>
    %270 = arith.addf %268, %269 : vector<2x64xf32>
    %271 = arith.negf %270 : vector<2x64xf32>
    %272 = math.exp %271 : vector<2x64xf32>
    %cst_49 = arith.constant 1.000000e+00 : f32
    %273 = vector.broadcast %cst_49 : f32 to vector<2x64xf32>
    %274 = arith.addf %273, %272 : vector<2x64xf32>
    %275 = arith.divf %273, %274 : vector<2x64xf32>
    %276 = vector.extract_strided_slice %275 {offsets = [0, 0], sizes = [2, 32], strides = [1, 1]} : vector<2x64xf32> to vector<2x32xf32>
    %277 = vector.extract_strided_slice %275 {offsets = [0, 32], sizes = [2, 32], strides = [1, 1]} : vector<2x64xf32> to vector<2x32xf32>
    %278 = vector.extract_strided_slice %267 {offsets = [0, 64], sizes = [2, 32], strides = [1, 1]} : vector<2x96xf32> to vector<2x32xf32>
    %279 = vector.extract_strided_slice %266 {offsets = [0, 64], sizes = [2, 32], strides = [1, 1]} : vector<2x96xf32> to vector<2x32xf32>
    %280 = vector.broadcast %7 : vector<1x32xf32> to vector<2x32xf32>
    %281 = arith.addf %279, %280 : vector<2x32xf32>
    %282 = arith.mulf %276, %281 : vector<2x32xf32>
    %283 = arith.addf %278, %282 : vector<2x32xf32>
    %284 = math.tanh %283 : vector<2x32xf32>
    %cst_50 = arith.constant 1.000000e+00 : f32
    %285 = vector.broadcast %cst_50 : f32 to vector<2x32xf32>
    %286 = arith.subf %285, %277 : vector<2x32xf32>
    %287 = arith.mulf %286, %284 : vector<2x32xf32>
    %288 = arith.mulf %277, %243 : vector<2x32xf32>
    %289 = arith.addf %287, %288 : vector<2x32xf32>
    %290 = tpu.concatenate %243, %265 in 1 : vector<2x32xf32>, vector<2x32xf32> -> vector<2x64xf32>
    %cst_51 = arith.constant dense<0.000000e+00> : vector<2x128xf32>
    %291 = tpu.matmul %290, %8, %cst_51 {dimension_numbers = #tpu.dot_dimension_numbers<[1], [0], [0], [1], [0, 0, 1, 1], [], []>} : vector<2x64xf32>, vector<64x128xf32>, vector<2x128xf32> -> vector<2x128xf32>
    %292 = vector.broadcast %9 : vector<1x128xf32> to vector<2x128xf32>
    %293 = arith.addf %291, %292 : vector<2x128xf32>
    %294 = vector.extract_strided_slice %293 {offsets = [0, 0], sizes = [2, 64], strides = [1, 1]} : vector<2x128xf32> to vector<2x64xf32>
    %295 = arith.negf %294 : vector<2x64xf32>
    %296 = math.exp %295 : vector<2x64xf32>
    %cst_52 = arith.constant 1.000000e+00 : f32
    %297 = vector.broadcast %cst_52 : f32 to vector<2x64xf32>
    %298 = arith.addf %297, %296 : vector<2x64xf32>
    %299 = arith.divf %297, %298 : vector<2x64xf32>
    %300 = vector.extract_strided_slice %299 {offsets = [0, 0], sizes = [2, 32], strides = [1, 1]} : vector<2x64xf32> to vector<2x32xf32>
    %301 = vector.extract_strided_slice %299 {offsets = [0, 32], sizes = [2, 32], strides = [1, 1]} : vector<2x64xf32> to vector<2x32xf32>
    %302 = vector.extract_strided_slice %293 {offsets = [0, 64], sizes = [2, 32], strides = [1, 1]} : vector<2x128xf32> to vector<2x32xf32>
    %303 = vector.extract_strided_slice %293 {offsets = [0, 96], sizes = [2, 32], strides = [1, 1]} : vector<2x128xf32> to vector<2x32xf32>
    %304 = arith.mulf %300, %303 : vector<2x32xf32>
    %305 = arith.addf %302, %304 : vector<2x32xf32>
    %306 = math.tanh %305 : vector<2x32xf32>
    %cst_53 = arith.constant 1.000000e+00 : f32
    %307 = vector.broadcast %cst_53 : f32 to vector<2x32xf32>
    %308 = arith.subf %307, %301 : vector<2x32xf32>
    %309 = arith.mulf %308, %306 : vector<2x32xf32>
    %310 = arith.mulf %301, %265 : vector<2x32xf32>
    %311 = arith.addf %309, %310 : vector<2x32xf32>
    %cst_54 = arith.constant dense<0.000000e+00> : vector<2x96xf32>
    %312 = tpu.matmul %289, %6, %cst_54 {dimension_numbers = #tpu.dot_dimension_numbers<[1], [0], [0], [1], [0, 0, 1, 1], [], []>} : vector<2x32xf32>, vector<32x96xf32>, vector<2x96xf32> -> vector<2x96xf32>
    %313 = vector.extract_strided_slice %5 {offsets = [14, 0], sizes = [2, 96], strides = [1, 1]} : vector<16x96xf32> to vector<2x96xf32>
    %314 = vector.extract_strided_slice %313 {offsets = [0, 0], sizes = [2, 64], strides = [1, 1]} : vector<2x96xf32> to vector<2x64xf32>
    %315 = vector.extract_strided_slice %312 {offsets = [0, 0], sizes = [2, 64], strides = [1, 1]} : vector<2x96xf32> to vector<2x64xf32>
    %316 = arith.addf %314, %315 : vector<2x64xf32>
    %317 = arith.negf %316 : vector<2x64xf32>
    %318 = math.exp %317 : vector<2x64xf32>
    %cst_55 = arith.constant 1.000000e+00 : f32
    %319 = vector.broadcast %cst_55 : f32 to vector<2x64xf32>
    %320 = arith.addf %319, %318 : vector<2x64xf32>
    %321 = arith.divf %319, %320 : vector<2x64xf32>
    %322 = vector.extract_strided_slice %321 {offsets = [0, 0], sizes = [2, 32], strides = [1, 1]} : vector<2x64xf32> to vector<2x32xf32>
    %323 = vector.extract_strided_slice %321 {offsets = [0, 32], sizes = [2, 32], strides = [1, 1]} : vector<2x64xf32> to vector<2x32xf32>
    %324 = vector.extract_strided_slice %313 {offsets = [0, 64], sizes = [2, 32], strides = [1, 1]} : vector<2x96xf32> to vector<2x32xf32>
    %325 = vector.extract_strided_slice %312 {offsets = [0, 64], sizes = [2, 32], strides = [1, 1]} : vector<2x96xf32> to vector<2x32xf32>
    %326 = vector.broadcast %7 : vector<1x32xf32> to vector<2x32xf32>
    %327 = arith.addf %325, %326 : vector<2x32xf32>
    %328 = arith.mulf %322, %327 : vector<2x32xf32>
    %329 = arith.addf %324, %328 : vector<2x32xf32>
    %330 = math.tanh %329 : vector<2x32xf32>
    %cst_56 = arith.constant 1.000000e+00 : f32
    %331 = vector.broadcast %cst_56 : f32 to vector<2x32xf32>
    %332 = arith.subf %331, %323 : vector<2x32xf32>
    %333 = arith.mulf %332, %330 : vector<2x32xf32>
    %334 = arith.mulf %323, %289 : vector<2x32xf32>
    %335 = arith.addf %333, %334 : vector<2x32xf32>
    %336 = tpu.concatenate %289, %311 in 1 : vector<2x32xf32>, vector<2x32xf32> -> vector<2x64xf32>
    %cst_57 = arith.constant dense<0.000000e+00> : vector<2x128xf32>
    %337 = tpu.matmul %336, %8, %cst_57 {dimension_numbers = #tpu.dot_dimension_numbers<[1], [0], [0], [1], [0, 0, 1, 1], [], []>} : vector<2x64xf32>, vector<64x128xf32>, vector<2x128xf32> -> vector<2x128xf32>
    %338 = vector.broadcast %9 : vector<1x128xf32> to vector<2x128xf32>
    %339 = arith.addf %337, %338 : vector<2x128xf32>
    %340 = vector.extract_strided_slice %339 {offsets = [0, 0], sizes = [2, 64], strides = [1, 1]} : vector<2x128xf32> to vector<2x64xf32>
    %341 = arith.negf %340 : vector<2x64xf32>
    %342 = math.exp %341 : vector<2x64xf32>
    %cst_58 = arith.constant 1.000000e+00 : f32
    %343 = vector.broadcast %cst_58 : f32 to vector<2x64xf32>
    %344 = arith.addf %343, %342 : vector<2x64xf32>
    %345 = arith.divf %343, %344 : vector<2x64xf32>
    %346 = vector.extract_strided_slice %345 {offsets = [0, 0], sizes = [2, 32], strides = [1, 1]} : vector<2x64xf32> to vector<2x32xf32>
    %347 = vector.extract_strided_slice %345 {offsets = [0, 32], sizes = [2, 32], strides = [1, 1]} : vector<2x64xf32> to vector<2x32xf32>
    %348 = vector.extract_strided_slice %339 {offsets = [0, 64], sizes = [2, 32], strides = [1, 1]} : vector<2x128xf32> to vector<2x32xf32>
    %349 = vector.extract_strided_slice %339 {offsets = [0, 96], sizes = [2, 32], strides = [1, 1]} : vector<2x128xf32> to vector<2x32xf32>
    %350 = arith.mulf %346, %349 : vector<2x32xf32>
    %351 = arith.addf %348, %350 : vector<2x32xf32>
    %352 = math.tanh %351 : vector<2x32xf32>
    %cst_59 = arith.constant 1.000000e+00 : f32
    %353 = vector.broadcast %cst_59 : f32 to vector<2x32xf32>
    %354 = arith.subf %353, %347 : vector<2x32xf32>
    %355 = arith.mulf %354, %352 : vector<2x32xf32>
    %356 = arith.mulf %347, %311 : vector<2x32xf32>
    %357 = arith.addf %355, %356 : vector<2x32xf32>
    %358 = tpu.concatenate %335, %357 in 1 : vector<2x32xf32>, vector<2x32xf32> -> vector<2x64xf32>
    %cst_60 = arith.constant dense<0.000000e+00> : vector<2x128xf32>
    %359 = tpu.matmul %358, %8, %cst_60 {dimension_numbers = #tpu.dot_dimension_numbers<[1], [0], [0], [1], [0, 0, 1, 1], [], []>} : vector<2x64xf32>, vector<64x128xf32>, vector<2x128xf32> -> vector<2x128xf32>
    %360 = vector.broadcast %9 : vector<1x128xf32> to vector<2x128xf32>
    %361 = arith.addf %359, %360 : vector<2x128xf32>
    %362 = vector.extract_strided_slice %361 {offsets = [0, 0], sizes = [2, 64], strides = [1, 1]} : vector<2x128xf32> to vector<2x64xf32>
    %363 = arith.negf %362 : vector<2x64xf32>
    %364 = math.exp %363 : vector<2x64xf32>
    %cst_61 = arith.constant 1.000000e+00 : f32
    %365 = vector.broadcast %cst_61 : f32 to vector<2x64xf32>
    %366 = arith.addf %365, %364 : vector<2x64xf32>
    %367 = arith.divf %365, %366 : vector<2x64xf32>
    %368 = vector.extract_strided_slice %367 {offsets = [0, 0], sizes = [2, 32], strides = [1, 1]} : vector<2x64xf32> to vector<2x32xf32>
    %369 = vector.extract_strided_slice %367 {offsets = [0, 32], sizes = [2, 32], strides = [1, 1]} : vector<2x64xf32> to vector<2x32xf32>
    %370 = vector.extract_strided_slice %361 {offsets = [0, 64], sizes = [2, 32], strides = [1, 1]} : vector<2x128xf32> to vector<2x32xf32>
    %371 = vector.extract_strided_slice %361 {offsets = [0, 96], sizes = [2, 32], strides = [1, 1]} : vector<2x128xf32> to vector<2x32xf32>
    %372 = arith.mulf %368, %371 : vector<2x32xf32>
    %373 = arith.addf %370, %372 : vector<2x32xf32>
    %374 = math.tanh %373 : vector<2x32xf32>
    %cst_62 = arith.constant 1.000000e+00 : f32
    %375 = vector.broadcast %cst_62 : f32 to vector<2x32xf32>
    %376 = arith.subf %375, %369 : vector<2x32xf32>
    %377 = arith.mulf %376, %374 : vector<2x32xf32>
    %378 = arith.mulf %369, %357 : vector<2x32xf32>
    %379 = arith.addf %377, %378 : vector<2x32xf32>
    %c0_63 = arith.constant 0 : index
    %c0_64 = arith.constant 0 : index
    %380 = vector.load %arg7[%c0_63, %c0_64] : memref<32x128xf32, #tpu.memory_space<vmem>>, vector<32x128xf32>
    %cst_65 = arith.constant dense<0.000000e+00> : vector<2x128xf32>
    %381 = tpu.matmul %379, %380, %cst_65 {dimension_numbers = #tpu.dot_dimension_numbers<[1], [0], [0], [1], [0, 0, 1, 1], [], []>} : vector<2x32xf32>, vector<32x128xf32>, vector<2x128xf32> -> vector<2x128xf32>
    %c0_66 = arith.constant 0 : index
    %c0_67 = arith.constant 0 : index
    %382 = vector.load %arg8[%c0_66, %c0_67] : memref<1x128xf32, #tpu.memory_space<vmem>>, vector<1x128xf32>
    %383 = vector.broadcast %382 : vector<1x128xf32> to vector<2x128xf32>
    %384 = arith.addf %381, %383 : vector<2x128xf32>
    %c0_68 = arith.constant 0 : index
    %c0_69 = arith.constant 0 : index
    %385 = vector.load %arg9[%c0_68, %c0_69] : memref<2x128xf32, #tpu.memory_space<vmem>>, vector<2x128xf32>
    tpu.vector_store %arg9[%c0_68, %c0_69], %384 {strides = array<i32>} : memref<2x128xf32, #tpu.memory_space<vmem>>, vector<2x128xf32>,
    return
  }
}

</mosaic_0001>

<bundles_post_ra>
// kernel: gru_forward.1
= control target key start
LH: loop header
LB: loop body
LE: loop exit
PB: predicated region body
PF: predicated region fallthrough
CT: control target
= control target key end

     0   :  { %14 = vsyncpa [#allocation3], 0  ;;  %s3135_s0 = inlined_call_operand.vmem [shape: f32[16,4], index: 0, kind: input, shape index: {}]   ;;  %s3136_s1 = inlined_call_operand.vmem [shape: f32[4,96], index: 1, kind: input, shape index: {}]   ;;  %s3137_s2 = inlined_call_operand.vmem [shape: f32[32,96], index: 2, kind: input, shape index: {}]   ;;  %s3138_s3 = inlined_call_operand.vmem [shape: f32[1,96], index: 3, kind: input, shape index: {}]   ;;  %s3139_s4 = inlined_call_operand.vmem [shape: f32[1,32], index: 4, kind: input, shape index: {}]   ;;  %s3140_s5 = inlined_call_operand.hbm [shape: f32[64,128], index: 5, kind: input, shape index: {}]   ;;  %s3141_s6 = inlined_call_operand.vmem [shape: f32[1,128], index: 6, kind: input, shape index: {}]   ;;  %s3142_s7 = inlined_call_operand.hbm [shape: f32[32,128], index: 7, kind: input, shape index: {}]   ;;  %s3143_s8 = inlined_call_operand.vmem [shape: f32[1,128], index: 8, kind: input, shape index: {}]   ;;  %s3144_s9 = inlined_call_operand.vmem [shape: f32[2,128], index: 9, kind: output, shape index: {}]  }
   0x1   :  { %15 = vsyncpa [#allocation5], 0  ;;  %s2691_s30 = smov [#allocation2]   ;;  %s2643_s13 = scalar_lea.hbm %s3140_s5, 1024 }
   0x2   :  { %s31_s10 = sshll.u32 %s2691_s30, 4  ;;  %p2644_p0 = scmp.ne.s32.totalorder %s3140_s5, %s2643_s13  ;;  %s32_s10 = int_to_ptr.vmem [resolvable:$true] %s31_s10 }
   0x3   :  { %p2647_p1 = scmp.lt.u32.totalorder %s2643_s13, %s3140_s5 }
   0x5   :  { %p2649_p2 = pnand %p2647_p1, %p2644_p0 }
   0x7   :  { %2652 = shalt.err (!%p2649_p2)
}
   0x8   :  { %s2653_s18 = scalar_lea.vmem %s32_s10, 1024  ;;  %p2658_p4 = scmp.lt.s32.totalorder %s32_s10, %s32_s10 }
   0x9   :  { %p2654_p3 = scmp.ne.s32.totalorder %s32_s10, %s2653_s18  ;;  %p2659_p5 = scmp.lt.s32.totalorder %s2653_s18, %s2653_s18 }
   0xb   :  { %p2660_p6 = por %p2659_p5, %p2658_p4 }
   0xd   :  { %p2661_p7 = pnand %p2660_p6, %p2654_p3 }
   0xf   :  { %2664 = shalt.err (!%p2661_p7)
}
  0x10   :  { %s2692_s19 = smov 128   ;;  %s2693_s20 = smov 8  }
  0x11   :  { %37 = dma.hbm_to_vmem [thread:$0]  %s3140_s5, 1024, %s32_s10, [#allocation3], %s2692_s19, %s2692_s19, %s2693_s20  }
  0x12   :  { %s2694_s23 = smov [#allocation4]   ;;  %s2665_s27 = scalar_lea.hbm %s3142_s7, 512 }
  0x13   :  { %s45_s24 = sshll.u32 %s2694_s23, 4  ;;  %p2666_p8 = scmp.ne.s32.totalorder %s3142_s7, %s2665_s27  ;;  %s46_s24 = int_to_ptr.vmem [resolvable:$true] %s45_s24 }
  0x14   :  { %p2669_p9 = scmp.lt.u32.totalorder %s2665_s27, %s3142_s7 }
  0x16   :  { %p2671_p10 = pnand %p2669_p9, %p2666_p8 }
  0x18   :  { %2674 = shalt.err (!%p2671_p10)
}
  0x19   :  { %s2675_s12 = scalar_lea.vmem %s46_s24, 512  ;;  %p2680_p12 = scmp.lt.s32.totalorder %s46_s24, %s46_s24 }
  0x1a   :  { %p2676_p11 = scmp.ne.s32.totalorder %s46_s24, %s2675_s12  ;;  %p2681_p13 = scmp.lt.s32.totalorder %s2675_s12, %s2675_s12 }
  0x1c   :  { %p2682_p0 = por %p2681_p13, %p2680_p12 }
  0x1e   :  { %p2683_p1 = pnand %p2682_p0, %p2676_p11 }
  0x20   :  { %2686 = shalt.err (!%p2683_p1)
}
  0x21   :  { %51 = dma.hbm_to_vmem [thread:$0]  %s3142_s7, 512, %s46_s24, [#allocation5], %s2692_s19, %s2692_s19, %s2693_s20  }
  0x22   :  { %2687 = dma.done.wait [#allocation3], 1024  }
  0x23   :  { %2688 = vsyncadd [#allocation3], 4294966272 }
  0x24   :  { %2689 = dma.done.wait [#allocation5], 512  }
  0x25   :  { %2690 = vsyncadd [#allocation5], 4294966784  ;;  %v2695_v0 = vmov 0.0|0.0   ;;  %vm2696_vm0 = vmmov 0   ;;  %v2697_v1 = vmov 0.0   ;;  %vm77_vm1 = vcmask 1043456  }
  0x26   :  { %2387 = vmatprep.subr.bf16.mxu1 %v2695_v0  ;;  %2144 = vmatprep.mubr.msk.f32.mxu1 %vm2696_vm0, %v2697_v1  ;;  %vm70_vm2 = vcmask 31744   ;;  %v156_v2 = vld [vmem:[%s3137_s2] sm:$0xff]  ;;  %v157_v3 = vld [vmem:[%s3137_s2 + $0x8] sm:$0xff]  ;;  %v158_v8 = vld [vmem:[%s3137_s2 + $0x10] sm:$0xff]  ;;  %vm170_vm3 = vcmask 261120   ;;  %vm395_vm4 = vcmask 523264  }
  0x27   :  { %v62_v4 = vld [vmem:[%s3136_s1] sm:$0xf]  ;;  %v2787_v5 = vpack.c.bf16 %v157_v3, %v156_v2  ;;  %v61_v7 = vld [vmem:[%s3135_s0 + $0x8] sm:$0xff]  ;;  %v159_v9 = vld [vmem:[%s3137_s2 + $0x18] sm:$0xff]  ;;  %s2700_s29 = smov 32  }
  0x28   :  { %2131 = vmatprep.subr.msk.mxu0 %vm77_vm1, %v62_v4  ;;  %v60_v6 = vld [vmem:[%s3135_s0] sm:$0xff]  ;;  %v2805_v11 = vpack.c.bf16 %v159_v9, %v158_v8  ;;  %s2698_s0 = smov 64   ;;  %v162_v31 = vld [vmem:[#allocation2 + $0x8] sm:$0xff]  ;;  %v163_v32 = vld [vmem:[#allocation2 + $0x10] sm:$0xff] }
  0x29   :  { %2132 = vmatpush3.msk.msra.mxu0 %vm77_vm1, %v62_v4  ;;  %2133 = vmatprep.mubr.msk.f32.mxu0 %vm70_vm2, %v60_v6  ;;  %v1977_v10 = vld [vmem:[%s3139_s4] ss:$0 sm:$0xff]  ;;  %v164_v34 = vld [vmem:[#allocation2 + $0x18] sm:$0xff]  ;;  %v166_v37 = vld [vmem:[#allocation2 + $0x28] sm:$0xff] }
  0x2a   :  { %2389 = vmatpush3.bf16.msra.mxu1 %v2787_v5  ;;  %2134 = vmatmul.mubr.msk.f32.vlgmr.msra.gmra.mrb[0].mxu0 %vm70_vm2, %v61_v7  ;;  %v1972_v13 = vld [vmem:[%s3138_s3] ss:$0 sm:$0xff]  ;;  %v2838_v35 = vpack.c.bf16 %v164_v34, %v163_v32  ;;  %v167_v40 = vld [vmem:[#allocation2 + $0x30] sm:$0xff]  ;;  %v168_v41 = vld [vmem:[#allocation2 + $0x38] sm:$0xff]  ;;  %s2699_s3 = smov 96  }
  0x2b   :  { %2390 = vmatprep.subr.bf16.mxu1 %v2695_v0  ;;  %256 = vrot.lane.b32.xlu0 %v1977_v10, %s2698_s0  ;;  %v161_v30 = vld [vmem:[#allocation2] sm:$0xff]  ;;  %v2847_v42 = vpack.c.bf16 %v168_v41, %v167_v40 }
  0x2c   :  { %2393 = vmatprep.subr.bf16.mxu0 %v2695_v0  ;;  %2155 = vmatprep.mubr.msk.f32.mxu0 %vm2696_vm0, %v2697_v1  ;;  %v2835_v33 = vpack.c.bf16 %v162_v31, %v161_v30  ;;  %v165_v36 = vld [vmem:[#allocation2 + $0x20] sm:$0xff] }
  0x2d   :  { %2395 = vmatpush3.bf16.msra.mxu0 %v2787_v5  ;;  %v2842_v38 = vpack.c.bf16 %v166_v37, %v165_v36  ;;  %v2876_v6 = vld [vmem:[%s3141_s6] ss:$0 sm:$0xff] }
  0x2e   :  { %2392 = vmatpush3.bf16.msra.mxu1 %v2805_v11  ;;  %2396 = vmatprep.subr.bf16.mxu0 %v2695_v0 }
  0x2f   :  { %2399 = vmatprep.subr.bf16.mxu1 %v2695_v0 }
  0x31   :  { %2145 = vmatmul.mubr.f32.vlgmr.msra.gmra.mrb[0].mxu1 %v2697_v1  ;;  %2398 = vmatpush3.bf16.msra.mxu0 %v2805_v11 }
  0x32   :  { %2174 = vmatprep.mubr.msk.f32.mxu1 %vm2696_vm0, %v2697_v1  ;;  %2411 = vmatprep.subr.bf16.mxu0 %v2695_v0 }
  0x33   :  { %2401 = vmatpush3.bf16.msra.mxu1 %v2835_v33 }
  0x34   :  { %2402 = vmatprep.subr.bf16.mxu1 %v2695_v0 }
  0x37   :  { %2404 = vmatpush3.bf16.msra.mxu1 %v2838_v35 }
  0x38   :  { %2405 = vmatprep.subr.bf16.mxu1 %v2695_v0 }
  0x3b   :  { %2407 = vmatpush3.bf16.msra.mxu1 %v2842_v38 }
  0x3c   :  { %2408 = vmatprep.subr.bf16.mxu1 %v2695_v0 }
  0x3f   :  { %2410 = vmatpush3.bf16.msra.mxu1 %v2847_v42 }
  0x40   :  { %2429 = vmatprep.subr.bf16.mxu1 %v2695_v0 }
  0x9d   :  { %v2826_v16 = vpop.permute.xlu0 %256 }
  0xfd   :  { %v2135_v12 = vpop.f32.mrb[0].mxu0 }
  0xfe   :  { %v2824_v14 = vadd.f32 %v2135_v12, %v1972_v13  ;;  %v147_v15 = vpop.f32.mrb[1].mxu0 }
  0xff   :  { %v2830_v20 = vadd.f32 %v1972_v13, %v147_v15 }
 0x104   :  { %v240_v17 = vpop.f32.mrb[0].mxu1 }
 0x105   :  { %v259_v18 = vadd.f32 %v2826_v16, %v240_v17  ;;  %v2146_v19 = vpop.f32.mrb[1].mxu1  ;;  %v244_v21 = vadd.f32 %v240_v17, %v2830_v20 }
 0x107   :  { %261 = vrot.lane.b32.xlu0 %v259_v18, %s2698_s0  ;;  %v1976_v22 = vmul.f32 -1.442695, %v244_v21 }
 0x109   :  { %2547 = vpow2.f32 %v1976_v22 }
 0x113   :  { %v2548_v23 = vpop.eup %2547 }
 0x114   :  { %v248_v24 = vadd.f32 1.0, %v2548_v23 }
 0x116   :  { %2549 = vrcp.f32 %v248_v24 }
 0x120   :  { %v2550_v25 = vpop.eup %2549 }
 0x121   :  { %v271_v43 = vsub.f32 1.0, %v2550_v25  ;;  %v277_v45 = vmul.f32 0.0, %v2550_v25 }
 0x179   :  { %v262_v26 = vpop.permute.xlu0 %261 }
 0x17a   :  { %v264_v27 = vmul.f32 %v2550_v25, %v262_v26 }
 0x17c   :  { %266 = vrot.lane.b32.xlu1 %v264_v27, %s2698_s0 }
 0x1ee   :  { %v267_v28 = vpop.permute.xlu1 %266 }
 0x1ef   :  { %v269_v29 = vadd.f32 %v267_v28, %v2830_v20 }
 0x1f1   :  { %2551 = vtanh.f32 %v269_v29 }
 0x1fb   :  { %v2552_v39 = vpop.eup %2551 }
 0x1fc   :  { %273 = vrot.lane.b32.xlu1 %v2552_v39, %s2699_s3 }
 0x26e   :  { %v274_v44 = vpop.permute.xlu1 %273 }
 0x26f   :  { %v276_v46 = vmul.f32 %v274_v44, %v271_v43 }
 0x271   :  { %v278_v47 = vadd.f32 %v277_v45, %v276_v46 }
 0x273   :  { %280 = vrot.lane.b32.xlu0 %v278_v47, %s2699_s3  ;;  %v383_v12 = vrot.slane %v278_v47, 6 }
 0x2e5   :  { %v281_v48 = vpop.permute.xlu0 %280 }
 0x2e6   :  { %v388_v49 = vsel %vm170_vm3, %v281_v48, 0.0  ;;  %2156 = vmatmul.mubr.msk.f32.vlgmr.msra.gmra.mrb[2].mxu0 %vm170_vm3, %v281_v48 }
 0x2e7   :  { %2175 = vmatmul.mubr.msk.f32.vlgmr.msra.gmra.mrb[2].mxu1 %vm395_vm4, %v388_v49  ;;  %2413 = vmatpush3.bf16.msra.mxu0 %v2787_v5 }
 0x2e8   :  { %2414 = vmatprep.subr.bf16.mxu0 %v2695_v0  ;;  %2185 = vmatprep.mubr.msk.f32.mxu0 %vm2696_vm0, %v2697_v1 }
 0x2e9   :  { %2431 = vmatpush3.bf16.msra.mxu1 %v2787_v5  ;;  %2215 = vmatprep.mubr.msk.f32.mxu1 %vm2696_vm0, %v2697_v1 }
 0x2ea   :  { %2432 = vmatprep.subr.bf16.mxu1 %v2695_v0 }
 0x2eb   :  { %2416 = vmatpush3.bf16.msra.mxu0 %v2805_v11 }
 0x2ec   :  { %2417 = vmatprep.subr.bf16.mxu0 %v2695_v0 }
 0x2ed   :  { %2434 = vmatpush3.bf16.msra.mxu1 %v2805_v11 }
 0x2ee   :  { %2435 = vmatprep.subr.bf16.mxu1 %v2695_v0 }
 0x3b9   :  { %v350_v50 = vpop.f32.mrb[2].mxu0 }
 0x3ba   :  { %v364_v51 = vadd.f32 %v350_v50, %v2826_v16  ;;  %v2157_v52 = vpop.f32.mrb[3].mxu0  ;;  %v465_v53 = vpop.f32.mrb[2].mxu1  ;;  %v355_v56 = vrot.slane %v350_v50, 6 }
 0x3bb   :  { %v2176_v54 = vpop.f32.mrb[3].mxu1  ;;  %v466_v7 = vadd.f32 %v2876_v6, %v465_v53 }
 0x3bc   :  { %v366_v55 = vrot.slane %v364_v51, 6  ;;  %v357_v57 = vadd.f32 %v355_v56, %v2830_v20 }
 0x3bd   :  { %v1982_v8 = vmul.f32 -1.442695, %v466_v7 }
 0x3be   :  { %367 = vrot.lane.b32.xlu1 %v366_v55, %s2698_s0  ;;  %v1979_v58 = vmul.f32 -1.442695, %v357_v57 }
 0x3c0   :  { %2553 = vpow2.f32 %v1979_v58 }
 0x3ca   :  { %v2554_v59 = vpop.eup %2553 }
 0x3cb   :  { %v361_v60 = vadd.f32 1.0, %v2554_v59 }
 0x3cd   :  { %2555 = vrcp.f32 %v361_v60 }
 0x3d7   :  { %v2556_v61 = vpop.eup %2555 }
 0x3d8   :  { %v377_v13 = vsub.f32 1.0, %v2556_v61  ;;  %v385_v18 = vmul.f32 %v2556_v61, %v383_v12 }
 0x430   :  { %v368_v62 = vpop.permute.xlu1 %367 }
 0x431   :  { %v370_v63 = vmul.f32 %v2556_v61, %v368_v62 }
 0x433   :  { %372 = vrot.lane.b32.xlu0 %v370_v63, %s2698_s0 }
 0x4a5   :  { %v373_v2 = vpop.permute.xlu0 %372 }
 0x4a6   :  { %v375_v3 = vadd.f32 %v373_v2, %v2830_v20 }
 0x4a8   :  { %2557 = vtanh.f32 %v375_v3 }
 0x4a9   :  { %2559 = vpow2.f32 %v1982_v8 }
 0x4b2   :  { %v2558_v4 = vpop.eup %2557 }
 0x4b3   :  { %379 = vrot.lane.b32.xlu1 %v2558_v4, %s2699_s3  ;;  %v2560_v9 = vpop.eup %2559 }
 0x4b4   :  { %v472_v10 = vadd.f32 1.0, %v2560_v9 }
 0x4b6   :  { %2561 = vrcp.f32 %v472_v10 }
 0x4b7   :  { %476 = vrot.lane.b32.xlu1 %v466_v7, %s2700_s29 }
 0x4c0   :  { %v2562_v23 = vpop.eup %2561 }
 0x4c1   :  { %v486_v29 = vsub.f32 1.0, %v2562_v23  ;;  %v492_v31 = vmul.f32 0.0, %v2562_v23 }
 0x525   :  { %v380_v15 = vpop.permute.xlu1 %379 }
 0x526   :  { %v382_v17 = vmul.f32 %v380_v15, %v377_v13 }
 0x528   :  { %v2881_v19 = vadd.f32 %v385_v18, %v382_v17 }
 0x529   :  { %v477_v22 = vpop.permute.xlu1 %476 }
 0x52a   :  { %v495_v21 = vrot.slane %v2881_v19, 2  ;;  %v479_v24 = vmul.f32 %v2562_v23, %v477_v22  ;;  %v599_v2 = vrot.slane %v2881_v19, 6 }
 0x52c   :  { %496 = vrot.lane.b32.xlu0 %v495_v21, %s2699_s3 }
 0x530   :  { %481 = vrot.lane.b32.xlu0 %v479_v24, %s2698_s0 }
 0x59e   :  { %v497_v25 = vpop.permute.xlu0 %496 }
 0x59f   :  { %2186 = vmatmul.mubr.msk.f32.vlgmr.msra.gmra.mrb[4].mxu0 %vm170_vm3, %v497_v25 }
 0x5a0   :  { %2419 = vmatpush3.bf16.msra.mxu0 %v2835_v33  ;;  %2204 = vmatprep.mubr.msk.f32.mxu0 %vm2696_vm0, %v2697_v1 }
 0x5a1   :  { %2420 = vmatprep.subr.bf16.mxu0 %v2695_v0 }
 0x5a2   :  { %v482_v26 = vpop.permute.xlu0 %481 }
 0x5a3   :  { %v484_v27 = vadd.f32 %v482_v26, %v466_v7 }
 0x5a4   :  { %2422 = vmatpush3.bf16.msra.mxu0 %v2838_v35 }
 0x5a5   :  { %2563 = vtanh.f32 %v484_v27  ;;  %2423 = vmatprep.subr.bf16.mxu0 %v2695_v0 }
 0x5a8   :  { %2425 = vmatpush3.bf16.msra.mxu0 %v2842_v38 }
 0x5a9   :  { %2426 = vmatprep.subr.bf16.mxu0 %v2695_v0 }
 0x5ac   :  { %2428 = vmatpush3.bf16.msra.mxu0 %v2847_v42 }
 0x5ad   :  { %2447 = vmatprep.subr.bf16.mxu0 %v2695_v0 }
 0x5af   :  { %v2564_v28 = vpop.eup %2563 }
 0x5b0   :  { %488 = vrot.lane.b32.xlu0 %v2564_v28, %s2699_s3 }
 0x5b4   :  { %603 = vrot.lane.b32.xlu0 %v2881_v19, %s2699_s3 }
 0x622   :  { %v489_v30 = vpop.permute.xlu0 %488 }
 0x623   :  { %v491_v32 = vmul.f32 %v489_v30, %v486_v29 }
 0x625   :  { %v2900_v34 = vadd.f32 %v492_v31, %v491_v32 }
 0x626   :  { %v604_v37 = vpop.permute.xlu0 %603 }
 0x627   :  { %v607_v36 = vrot.slane %v2900_v34, 6 }
 0x629   :  { %v609_v39 = vsel %vm170_vm3, %v604_v37, %v607_v36 }
 0x62a   :  { %v611_v40 = vrot.slane %v609_v39, 2 }
 0x62c   :  { %2205 = vmatmul.mubr.msk.f32.vlgmr.msra.gmra.mrb[6].mxu0 %vm395_vm4, %v611_v40 }
 0x62d   :  { %2449 = vmatpush3.bf16.msra.mxu0 %v2787_v5  ;;  %2245 = vmatprep.mubr.msk.f32.mxu0 %vm2696_vm0, %v2697_v1 }
 0x62e   :  { %2450 = vmatprep.subr.bf16.mxu0 %v2695_v0 }
 0x631   :  { %2452 = vmatpush3.bf16.msra.mxu0 %v2805_v11 }
 0x632   :  { %2453 = vmatprep.subr.bf16.mxu0 %v2695_v0 }
 0x672   :  { %v566_v41 = vpop.f32.mrb[4].mxu0 }
 0x673   :  { %v580_v43 = vadd.f32 %v566_v41, %v2826_v16  ;;  %v2187_v44 = vpop.f32.mrb[5].mxu0  ;;  %v571_v46 = vrot.slane %v566_v41, 4 }
 0x675   :  { %v582_v45 = vrot.slane %v580_v43, 4  ;;  %v573_v47 = vadd.f32 %v571_v46, %v2830_v20 }
 0x677   :  { %583 = vrot.lane.b32.xlu1 %v582_v45, %s2698_s0  ;;  %v1984_v48 = vmul.f32 -1.442695, %v573_v47 }
 0x679   :  { %2565 = vpow2.f32 %v1984_v48 }
 0x683   :  { %v2566_v49 = vpop.eup %2565 }
 0x684   :  { %v577_v50 = vadd.f32 1.0, %v2566_v49 }
 0x686   :  { %2567 = vrcp.f32 %v577_v50 }
 0x690   :  { %v2568_v51 = vpop.eup %2567 }
 0x691   :  { %v593_v63 = vsub.f32 1.0, %v2568_v51  ;;  %v601_v4 = vmul.f32 %v2568_v51, %v599_v2 }
 0x6e9   :  { %v584_v52 = vpop.permute.xlu1 %583 }
 0x6ea   :  { %v586_v53 = vmul.f32 %v2568_v51, %v584_v52 }
 0x6ec   :  { %588 = vrot.lane.b32.xlu1 %v586_v53, %s2698_s0 }
 0x6ff   :  { %v680_v54 = vpop.f32.mrb[6].mxu0 }
 0x700   :  { %v2206_v55 = vpop.f32.mrb[7].mxu0  ;;  %v681_v59 = vadd.f32 %v2876_v6, %v680_v54 }
 0x702   :  { %v1986_v60 = vmul.f32 -1.442695, %v681_v59 }
 0x75e   :  { %v589_v56 = vpop.permute.xlu1 %588 }
 0x75f   :  { %v591_v57 = vadd.f32 %v589_v56, %v2830_v20 }
 0x761   :  { %2569 = vtanh.f32 %v591_v57 }
 0x762   :  { %2571 = vpow2.f32 %v1986_v60 }
 0x76b   :  { %v2570_v58 = vpop.eup %2569 }
 0x76c   :  { %595 = vrot.lane.b32.xlu1 %v2570_v58, %s2699_s3  ;;  %v2572_v61 = vpop.eup %2571 }
 0x76d   :  { %v687_v62 = vadd.f32 1.0, %v2572_v61 }
 0x76f   :  { %2573 = vrcp.f32 %v687_v62 }
 0x770   :  { %691 = vrot.lane.b32.xlu1 %v681_v59, %s2700_s29 }
 0x779   :  { %v2574_v12 = vpop.eup %2573 }
 0x77a   :  { %v701_v31 = vsub.f32 1.0, %v2574_v12  ;;  %v707_v36 = vmul.f32 %v2574_v12, %v2900_v34 }
 0x7de   :  { %v596_v3 = vpop.permute.xlu1 %595 }
 0x7df   :  { %v598_v7 = vmul.f32 %v596_v3, %v593_v63 }
 0x7e1   :  { %v2920_v8 = vadd.f32 %v601_v4, %v598_v7 }
 0x7e2   :  { %v692_v10 = vpop.permute.xlu1 %691 }
 0x7e3   :  { %v710_v9 = vrot.slane %v2920_v8, 4  ;;  %v694_v13 = vmul.f32 %v2574_v12, %v692_v10  ;;  %v814_v53 = vrot.slane %v2920_v8, 6 }
 0x7e5   :  { %711 = vrot.lane.b32.xlu0 %v710_v9, %s2699_s3 }
 0x7e9   :  { %696 = vrot.lane.b32.xlu0 %v694_v13, %s2698_s0 }
 0x857   :  { %v712_v15 = vpop.permute.xlu0 %711 }
 0x858   :  { %2216 = vmatmul.mubr.msk.f32.vlgmr.msra.gmra.mrb[4].mxu1 %vm170_vm3, %v712_v15 }
 0x859   :  { %2437 = vmatpush3.bf16.msra.mxu1 %v2835_v33  ;;  %2234 = vmatprep.mubr.msk.f32.mxu1 %vm2696_vm0, %v2697_v1 }
 0x85a   :  { %2438 = vmatprep.subr.bf16.mxu1 %v2695_v0 }
 0x85b   :  { %v697_v17 = vpop.permute.xlu0 %696 }
 0x85c   :  { %v699_v18 = vadd.f32 %v697_v17, %v681_v59 }
 0x85d   :  { %2440 = vmatpush3.bf16.msra.mxu1 %v2838_v35 }
 0x85e   :  { %2575 = vtanh.f32 %v699_v18  ;;  %2441 = vmatprep.subr.bf16.mxu1 %v2695_v0 }
 0x861   :  { %2443 = vmatpush3.bf16.msra.mxu1 %v2842_v38 }
 0x862   :  { %2444 = vmatprep.subr.bf16.mxu1 %v2695_v0 }
 0x865   :  { %2446 = vmatpush3.bf16.msra.mxu1 %v2847_v42 }
 0x866   :  { %2465 = vmatprep.subr.bf16.mxu1 %v2695_v0 }
 0x868   :  { %v2576_v19 = vpop.eup %2575 }
 0x869   :  { %703 = vrot.lane.b32.xlu0 %v2576_v19, %s2699_s3 }
 0x8db   :  { %v704_v30 = vpop.permute.xlu0 %703 }
 0x8dc   :  { %v706_v32 = vmul.f32 %v704_v30, %v701_v31 }
 0x8de   :  { %v2943_v37 = vadd.f32 %v707_v36, %v706_v32 }
 0x8e0   :  { %v822_v43 = vrot.slane %v2943_v37, 4 }
 0x92b   :  { %v781_v21 = vpop.f32.mrb[4].mxu1 }
 0x92c   :  { %v795_v22 = vadd.f32 %v781_v21, %v2826_v16  ;;  %v2217_v23 = vpop.f32.mrb[5].mxu1  ;;  %v786_v25 = vrot.slane %v781_v21, 2 }
 0x92e   :  { %v797_v24 = vrot.slane %v795_v22, 2  ;;  %v788_v26 = vadd.f32 %v786_v25, %v2830_v20 }
 0x930   :  { %798 = vrot.lane.b32.xlu1 %v797_v24, %s2698_s0  ;;  %v1988_v27 = vmul.f32 -1.442695, %v788_v26 }
 0x932   :  { %2577 = vpow2.f32 %v1988_v27 }
 0x934   :  { %818 = vrot.lane.b32.xlu1 %v2920_v8, %s2699_s3 }
 0x93c   :  { %v2578_v28 = vpop.eup %2577 }
 0x93d   :  { %v792_v29 = vadd.f32 1.0, %v2578_v28 }
 0x93f   :  { %2579 = vrcp.f32 %v792_v29 }
 0x949   :  { %v2580_v39 = vpop.eup %2579 }
 0x94a   :  { %v808_v52 = vsub.f32 1.0, %v2580_v39  ;;  %v816_v55 = vmul.f32 %v2580_v39, %v814_v53 }
 0x9a2   :  { %v799_v40 = vpop.permute.xlu1 %798 }
 0x9a3   :  { %v801_v41 = vmul.f32 %v2580_v39, %v799_v40 }
 0x9a5   :  { %803 = vrot.lane.b32.xlu0 %v801_v41, %s2698_s0 }
 0x9a6   :  { %v819_v44 = vpop.permute.xlu1 %818 }
 0x9a7   :  { %v824_v45 = vsel %vm170_vm3, %v819_v44, %v822_v43 }
 0x9a8   :  { %v826_v46 = vrot.slane %v824_v45, 4 }
 0x9aa   :  { %2235 = vmatmul.mubr.msk.f32.vlgmr.msra.gmra.mrb[6].mxu1 %vm395_vm4, %v826_v46 }
 0x9ab   :  { %2467 = vmatpush3.bf16.msra.mxu1 %v2787_v5  ;;  %2275 = vmatprep.mubr.msk.f32.mxu1 %vm2696_vm0, %v2697_v1 }
 0x9ac   :  { %2468 = vmatprep.subr.bf16.mxu1 %v2695_v0 }
 0x9af   :  { %2470 = vmatpush3.bf16.msra.mxu1 %v2805_v11 }
 0x9b0   :  { %2471 = vmatprep.subr.bf16.mxu1 %v2695_v0 }
 0xa17   :  { %v804_v34 = vpop.permute.xlu0 %803 }
 0xa18   :  { %v806_v47 = vadd.f32 %v804_v34, %v2830_v20 }
 0xa1a   :  { %2581 = vtanh.f32 %v806_v47 }
 0xa24   :  { %v2582_v48 = vpop.eup %2581 }
 0xa25   :  { %810 = vrot.lane.b32.xlu1 %v2582_v48, %s2699_s3 }
 0xa7d   :  { %v895_v49 = vpop.f32.mrb[6].mxu1 }
 0xa7e   :  { %v896_v50 = vadd.f32 %v2876_v6, %v895_v49  ;;  %v2236_v51 = vpop.f32.mrb[7].mxu1 }
 0xa80   :  { %906 = vrot.lane.b32.xlu1 %v896_v50, %s2700_s29  ;;  %v1990_v58 = vmul.f32 -1.442695, %v896_v50 }
 0xa82   :  { %2583 = vpow2.f32 %v1990_v58 }
 0xa8c   :  { %v2584_v59 = vpop.eup %2583 }
 0xa8d   :  { %v902_v60 = vadd.f32 1.0, %v2584_v59 }
 0xa8f   :  { %2585 = vrcp.f32 %v902_v60 }
 0xa97   :  { %v811_v54 = vpop.permute.xlu1 %810 }
 0xa98   :  { %v813_v56 = vmul.f32 %v811_v54, %v808_v52 }
 0xa99   :  { %v2586_v61 = vpop.eup %2585 }
 0xa9a   :  { %v2960_v57 = vadd.f32 %v816_v55, %v813_v56  ;;  %v916_v12 = vsub.f32 1.0, %v2586_v61  ;;  %v922_v15 = vmul.f32 %v2586_v61, %v2943_v37 }
 0xa9c   :  { %v925_v20 = vrot.slane %v2960_v57, 6 }
 0xa9e   :  { %926 = vrot.lane.b32.xlu0 %v925_v20, %s2699_s3 }
 0xaf2   :  { %v907_v62 = vpop.permute.xlu1 %906 }
 0xaf3   :  { %v909_v63 = vmul.f32 %v2586_v61, %v907_v62 }
 0xaf5   :  { %911 = vrot.lane.b32.xlu0 %v909_v63, %s2698_s0 }
 0xaf9   :  { %1028 = vrot.lane.b32.xlu0 %v2960_v57, %s2699_s3 }
 0xb10   :  { %v927_v2 = vpop.permute.xlu0 %926 }
 0xb11   :  { %2246 = vmatmul.mubr.msk.f32.vlgmr.msra.gmra.mrb[8].mxu0 %vm170_vm3, %v927_v2 }
 0xb12   :  { %2455 = vmatpush3.bf16.msra.mxu0 %v2835_v33  ;;  %2264 = vmatprep.mubr.msk.f32.mxu0 %vm2696_vm0, %v2697_v1 }
 0xb13   :  { %2456 = vmatprep.subr.bf16.mxu0 %v2695_v0 }
 0xb16   :  { %2458 = vmatpush3.bf16.msra.mxu0 %v2838_v35 }
 0xb17   :  { %2459 = vmatprep.subr.bf16.mxu0 %v2695_v0 }
 0xb1a   :  { %2461 = vmatpush3.bf16.msra.mxu0 %v2842_v38 }
 0xb1b   :  { %2462 = vmatprep.subr.bf16.mxu0 %v2695_v0 }
 0xb1e   :  { %2464 = vmatpush3.bf16.msra.mxu0 %v2847_v42 }
 0xb1f   :  { %2483 = vmatprep.subr.bf16.mxu0 %v2695_v0 }
 0xb67   :  { %v912_v3 = vpop.permute.xlu0 %911 }
 0xb68   :  { %v914_v4 = vadd.f32 %v912_v3, %v896_v50 }
 0xb6a   :  { %2587 = vtanh.f32 %v914_v4 }
 0xb6b   :  { %v1029_v21 = vpop.permute.xlu0 %1028 }
 0xb74   :  { %v2588_v7 = vpop.eup %2587 }
 0xb75   :  { %918 = vrot.lane.b32.xlu1 %v2588_v7, %s2699_s3 }
 0xbe4   :  { %v996_v8 = vpop.f32.mrb[8].mxu0 }
 0xbe5   :  { %v1007_v9 = vadd.f32 %v996_v8, %v2826_v16  ;;  %v2247_v10 = vpop.f32.mrb[9].mxu0  ;;  %v1000_v24 = vadd.f32 %v996_v8, %v2824_v14 }
 0xbe7   :  { %1009 = vrot.lane.b32.xlu1 %v1007_v9, %s2698_s0  ;;  %v919_v13 = vpop.permute.xlu1 %918  ;;  %v1992_v25 = vmul.f32 -1.442695, %v1000_v24 }
 0xbe8   :  { %v921_v17 = vmul.f32 %v919_v13, %v916_v12 }
 0xbe9   :  { %2589 = vpow2.f32 %v1992_v25 }
 0xbea   :  { %v2984_v18 = vadd.f32 %v922_v15, %v921_v17 }
 0xbec   :  { %v1032_v19 = vrot.slane %v2984_v18, 2 }
 0xbee   :  { %v1034_v22 = vsel %vm170_vm3, %v1029_v21, %v1032_v19 }
 0xbef   :  { %v1036_v23 = vrot.slane %v1034_v22, 6 }
 0xbf1   :  { %2265 = vmatmul.mubr.msk.f32.vlgmr.msra.gmra.mrb[10].mxu0 %vm395_vm4, %v1036_v23 }
 0xbf2   :  { %2485 = vmatpush3.bf16.msra.mxu0 %v2787_v5  ;;  %2305 = vmatprep.mubr.msk.f32.mxu0 %vm2696_vm0, %v2697_v1 }
 0xbf3   :  { %2486 = vmatprep.subr.bf16.mxu0 %v2695_v0  ;;  %v2590_v26 = vpop.eup %2589 }
 0xbf4   :  { %v1004_v27 = vadd.f32 1.0, %v2590_v26 }
 0xbf6   :  { %2488 = vmatpush3.bf16.msra.mxu0 %v2805_v11  ;;  %2591 = vrcp.f32 %v1004_v27 }
 0xbf7   :  { %2489 = vmatprep.subr.bf16.mxu0 %v2695_v0 }
 0xc00   :  { %v2592_v28 = vpop.eup %2591 }
 0xc01   :  { %v1019_v45 = vsub.f32 1.0, %v2592_v28  ;;  %v1026_v34 = vmul.f32 %v2592_v28, %v925_v20 }
 0xc59   :  { %v1010_v29 = vpop.permute.xlu1 %1009 }
 0xc5a   :  { %v1012_v30 = vmul.f32 %v2592_v28, %v1010_v29 }
 0xc5c   :  { %1014 = vrot.lane.b32.xlu0 %v1012_v30, %s2698_s0 }
 0xcc4   :  { %v1105_v31 = vpop.f32.mrb[10].mxu0 }
 0xcc5   :  { %v2266_v32 = vpop.f32.mrb[11].mxu0  ;;  %v1106_v40 = vadd.f32 %v2876_v6, %v1105_v31 }
 0xcc7   :  { %v1994_v41 = vmul.f32 -1.442695, %v1106_v40 }
 0xcce   :  { %v1015_v36 = vpop.permute.xlu0 %1014 }
 0xccf   :  { %v1017_v37 = vadd.f32 %v1015_v36, %v2824_v14 }
 0xcd1   :  { %2593 = vtanh.f32 %v1017_v37 }
 0xcd2   :  { %2595 = vpow2.f32 %v1994_v41 }
 0xcdb   :  { %v2594_v39 = vpop.eup %2593 }
 0xcdc   :  { %1021 = vrot.lane.b32.xlu1 %v2594_v39, %s2699_s3  ;;  %v2596_v43 = vpop.eup %2595 }
 0xcdd   :  { %v1112_v44 = vadd.f32 1.0, %v2596_v43 }
 0xcdf   :  { %2597 = vrcp.f32 %v1112_v44 }
 0xce0   :  { %1116 = vrot.lane.b32.xlu1 %v1106_v40, %s2700_s29 }
 0xce9   :  { %v2598_v50 = vpop.eup %2597 }
 0xcea   :  { %v1126_v56 = vsub.f32 1.0, %v2598_v50  ;;  %v1132_v20 = vmul.f32 %v2598_v50, %v2984_v18 }
 0xd4e   :  { %v1022_v46 = vpop.permute.xlu1 %1021 }
 0xd4f   :  { %v1024_v47 = vmul.f32 %v1022_v46, %v1019_v45 }
 0xd51   :  { %v3003_v48 = vadd.f32 %v1026_v34, %v1024_v47 }
 0xd52   :  { %v1117_v49 = vpop.permute.xlu1 %1116 }
 0xd53   :  { %1135 = vrot.lane.b32.xlu0 %v3003_v48, %s2699_s3  ;;  %v1119_v51 = vmul.f32 %v2598_v50, %v1117_v49  ;;  %v1238_v27 = vrot.slane %v3003_v48, 6 }
 0xd57   :  { %1121 = vrot.lane.b32.xlu0 %v1119_v51, %s2698_s0 }
 0xdc5   :  { %v1136_v52 = vpop.permute.xlu0 %1135 }
 0xdc6   :  { %2276 = vmatmul.mubr.msk.f32.vlgmr.msra.gmra.mrb[8].mxu1 %vm170_vm3, %v1136_v52 }
 0xdc7   :  { %2473 = vmatpush3.bf16.msra.mxu1 %v2835_v33  ;;  %2294 = vmatprep.mubr.msk.f32.mxu1 %vm2696_vm0, %v2697_v1 }
 0xdc8   :  { %2474 = vmatprep.subr.bf16.mxu1 %v2695_v0 }
 0xdc9   :  { %v1122_v53 = vpop.permute.xlu0 %1121 }
 0xdca   :  { %v1124_v54 = vadd.f32 %v1122_v53, %v1106_v40 }
 0xdcb   :  { %2476 = vmatpush3.bf16.msra.mxu1 %v2838_v35 }
 0xdcc   :  { %2599 = vtanh.f32 %v1124_v54  ;;  %2477 = vmatprep.subr.bf16.mxu1 %v2695_v0 }
 0xdcf   :  { %2479 = vmatpush3.bf16.msra.mxu1 %v2842_v38 }
 0xdd0   :  { %2480 = vmatprep.subr.bf16.mxu1 %v2695_v0 }
 0xdd3   :  { %2482 = vmatpush3.bf16.msra.mxu1 %v2847_v42 }
 0xdd4   :  { %2501 = vmatprep.subr.bf16.mxu1 %v2695_v0 }
 0xdd6   :  { %v2600_v55 = vpop.eup %2599 }
 0xdd7   :  { %1128 = vrot.lane.b32.xlu1 %v2600_v55, %s2699_s3 }
 0xe49   :  { %v1129_v57 = vpop.permute.xlu1 %1128 }
 0xe4a   :  { %v1131_v58 = vmul.f32 %v1129_v57, %v1126_v56 }
 0xe4c   :  { %v3021_v59 = vadd.f32 %v1132_v20, %v1131_v58 }
 0xe4e   :  { %v1243_v60 = vsel %vm170_vm3, %v1136_v52, %v3021_v59 }
 0xe4f   :  { %2295 = vmatmul.mubr.msk.f32.vlgmr.msra.gmra.mrb[10].mxu1 %vm395_vm4, %v1243_v60 }
 0xe50   :  { %2503 = vmatpush3.bf16.msra.mxu1 %v2787_v5  ;;  %2335 = vmatprep.mubr.msk.f32.mxu1 %vm2696_vm0, %v2697_v1 }
 0xe51   :  { %2504 = vmatprep.subr.bf16.mxu1 %v2695_v0 }
 0xe54   :  { %2506 = vmatpush3.bf16.msra.mxu1 %v2805_v11 }
 0xe55   :  { %2507 = vmatprep.subr.bf16.mxu1 %v2695_v0 }
 0xe99   :  { %v1205_v61 = vpop.f32.mrb[8].mxu1 }
 0xe9a   :  { %v1219_v62 = vadd.f32 %v1205_v61, %v2826_v16  ;;  %v2277_v63 = vpop.f32.mrb[9].mxu1  ;;  %v1210_v3 = vrot.slane %v1205_v61, 6 }
 0xe9c   :  { %v1221_v2 = vrot.slane %v1219_v62, 6  ;;  %v1212_v4 = vadd.f32 %v1210_v3, %v2824_v14 }
 0xe9e   :  { %1222 = vrot.lane.b32.xlu0 %v1221_v2, %s2698_s0  ;;  %v1996_v5 = vmul.f32 -1.442695, %v1212_v4 }
 0xea0   :  { %2601 = vpow2.f32 %v1996_v5 }
 0xeaa   :  { %v2602_v7 = vpop.eup %2601 }
 0xeab   :  { %v1216_v8 = vadd.f32 1.0, %v2602_v7 }
 0xead   :  { %2603 = vrcp.f32 %v1216_v8 }
 0xeb7   :  { %v2604_v9 = vpop.eup %2603 }
 0xeb8   :  { %v1232_v28 = vsub.f32 1.0, %v2604_v9  ;;  %v1240_v30 = vmul.f32 %v2604_v9, %v1238_v27 }
 0xf10   :  { %v1223_v10 = vpop.permute.xlu0 %1222 }
 0xf11   :  { %v1225_v11 = vmul.f32 %v2604_v9, %v1223_v10 }
 0xf13   :  { %1227 = vrot.lane.b32.xlu1 %v1225_v11, %s2698_s0 }
 0xf22   :  { %v1313_v12 = vpop.f32.mrb[10].mxu1 }
 0xf23   :  { %v1314_v13 = vadd.f32 %v2876_v6, %v1313_v12  ;;  %v2296_v15 = vpop.f32.mrb[11].mxu1 }
 0xf25   :  { %1324 = vrot.lane.b32.xlu1 %v1314_v13, %s2700_s29  ;;  %v1998_v17 = vmul.f32 -1.442695, %v1314_v13 }
 0xf27   :  { %2605 = vpow2.f32 %v1998_v17 }
 0xf31   :  { %v2606_v19 = vpop.eup %2605 }
 0xf32   :  { %v1320_v22 = vadd.f32 1.0, %v2606_v19 }
 0xf85   :  { %v1228_v18 = vpop.permute.xlu1 %1227 }
 0xf86   :  { %v1230_v21 = vadd.f32 %v1228_v18, %v2824_v14 }
 0xf88   :  { %2607 = vtanh.f32 %v1230_v21 }
 0xf89   :  { %2609 = vrcp.f32 %v1320_v22 }
 0xf92   :  { %v2608_v23 = vpop.eup %2607 }
 0xf93   :  { %1234 = vrot.lane.b32.xlu0 %v2608_v23, %s2699_s3  ;;  %v2610_v24 = vpop.eup %2609 }
 0xf94   :  { %v1334_v43 = vsub.f32 1.0, %v2610_v24  ;;  %v1340_v45 = vmul.f32 %v2610_v24, %v3021_v59 }
 0xf97   :  { %v1325_v25 = vpop.permute.xlu1 %1324 }
 0xf98   :  { %v1327_v26 = vmul.f32 %v2610_v24, %v1325_v25 }
 0xf9a   :  { %1329 = vrot.lane.b32.xlu1 %v1327_v26, %s2698_s0 }
0x1005   :  { %v1235_v29 = vpop.permute.xlu0 %1234 }
0x1006   :  { %v1237_v31 = vmul.f32 %v1235_v29, %v1232_v28 }
0x1008   :  { %v3042_v32 = vadd.f32 %v1240_v30, %v1237_v31 }
0x100a   :  { %1451 = vrot.lane.b32.xlu1 %v3042_v32, %s2699_s3  ;;  %v1343_v36 = vrot.slane %v3042_v32, 2  ;;  %v1447_v19 = vrot.slane %v3042_v32, 6 }
0x100c   :  { %1344 = vrot.lane.b32.xlu0 %v1343_v36, %s2699_s3  ;;  %v1330_v37 = vpop.permute.xlu1 %1329 }
0x100d   :  { %v1332_v39 = vadd.f32 %v1330_v37, %v1314_v13 }
0x100f   :  { %2611 = vtanh.f32 %v1332_v39 }
0x1019   :  { %v2612_v40 = vpop.eup %2611 }
0x101a   :  { %1336 = vrot.lane.b32.xlu0 %v2612_v40, %s2699_s3 }
0x107c   :  { %v1452_v48 = vpop.permute.xlu1 %1451 }
0x107e   :  { %v1345_v41 = vpop.permute.xlu0 %1344 }
0x107f   :  { %2306 = vmatmul.mubr.msk.f32.vlgmr.msra.gmra.mrb[12].mxu0 %vm170_vm3, %v1345_v41 }
0x1080   :  { %2491 = vmatpush3.bf16.msra.mxu0 %v2835_v33  ;;  %2324 = vmatprep.mubr.msk.f32.mxu0 %vm2696_vm0, %v2697_v1 }
0x1081   :  { %2492 = vmatprep.subr.bf16.mxu0 %v2695_v0 }
0x1084   :  { %2494 = vmatpush3.bf16.msra.mxu0 %v2838_v35 }
0x1085   :  { %2495 = vmatprep.subr.bf16.mxu0 %v2695_v0 }
0x1088   :  { %2497 = vmatpush3.bf16.msra.mxu0 %v2842_v38 }
0x1089   :  { %2498 = vmatprep.subr.bf16.mxu0 %v2695_v0 }
0x108c   :  { %v1337_v44 = vpop.permute.xlu0 %1336  ;;  %2500 = vmatpush3.bf16.msra.mxu0 %v2847_v42 }
0x108d   :  { %v1339_v46 = vmul.f32 %v1337_v44, %v1334_v43  ;;  %2519 = vmatprep.subr.bf16.mxu0 %v2695_v0 }
0x108f   :  { %v3061_v34 = vadd.f32 %v1340_v45, %v1339_v46 }
0x1091   :  { %v1455_v47 = vrot.slane %v3061_v34, 6 }
0x1093   :  { %v1457_v49 = vsel %vm170_vm3, %v1452_v48, %v1455_v47 }
0x1094   :  { %v1459_v50 = vrot.slane %v1457_v49, 2 }
0x1096   :  { %2325 = vmatmul.mubr.msk.f32.vlgmr.msra.gmra.mrb[14].mxu0 %vm395_vm4, %v1459_v50 }
0x1097   :  { %2521 = vmatpush3.bf16.msra.mxu0 %v2835_v33  ;;  %2373 = vmatprep.mubr.msk.f32.mxu0 %vm2696_vm0, %v2697_v1 }
0x1098   :  { %2522 = vmatprep.subr.bf16.mxu0 %v2695_v0 }
0x109b   :  { %2524 = vmatpush3.bf16.msra.mxu0 %v2838_v35 }
0x109c   :  { %2525 = vmatprep.subr.bf16.mxu0 %v2695_v0 }
0x109f   :  { %2527 = vmatpush3.bf16.msra.mxu0 %v2842_v38 }
0x10a0   :  { %2528 = vmatprep.subr.bf16.mxu0 %v2695_v0 }
0x10a3   :  { %2530 = vmatpush3.bf16.msra.mxu0 %v2847_v42 }
0x1152   :  { %v1414_v51 = vpop.f32.mrb[12].mxu0 }
0x1153   :  { %v1428_v52 = vadd.f32 %v1414_v51, %v2826_v16  ;;  %v2307_v53 = vpop.f32.mrb[13].mxu0  ;;  %v1419_v20 = vrot.slane %v1414_v51, 4 }
0x1155   :  { %v1430_v54 = vrot.slane %v1428_v52, 4  ;;  %v1421_v58 = vadd.f32 %v1419_v20, %v2824_v14 }
0x1157   :  { %1431 = vrot.lane.b32.xlu0 %v1430_v54, %s2698_s0  ;;  %v2000_v59 = vmul.f32 -1.442695, %v1421_v58 }
0x1159   :  { %2613 = vpow2.f32 %v2000_v59 }
0x1163   :  { %v2614_v60 = vpop.eup %2613 }
0x1164   :  { %v1425_v61 = vadd.f32 1.0, %v2614_v60 }
0x1166   :  { %2615 = vrcp.f32 %v1425_v61 }
0x1169   :  { %v1528_v55 = vpop.f32.mrb[14].mxu0 }
0x116a   :  { %v1529_v56 = vadd.f32 %v2876_v6, %v1528_v55  ;;  %v2326_v57 = vpop.f32.mrb[15].mxu0 }
0x116c   :  { %1539 = vrot.lane.b32.xlu0 %v1529_v56, %s2700_s29  ;;  %v2002_v62 = vmul.f32 -1.442695, %v1529_v56 }
0x116e   :  { %2617 = vpow2.f32 %v2002_v62 }
0x1170   :  { %v2616_v63 = vpop.eup %2615 }
0x1171   :  { %v1441_v18 = vsub.f32 1.0, %v2616_v63  ;;  %v1449_v22 = vmul.f32 %v2616_v63, %v1447_v19 }
0x1178   :  { %v2618_v4 = vpop.eup %2617 }
0x1179   :  { %v1535_v5 = vadd.f32 1.0, %v2618_v4 }
0x117b   :  { %2619 = vrcp.f32 %v1535_v5 }
0x1185   :  { %v2620_v7 = vpop.eup %2619 }
0x1186   :  { %v1549_v27 = vsub.f32 1.0, %v2620_v7  ;;  %v1555_v30 = vmul.f32 %v2620_v7, %v3061_v34 }
0x11c9   :  { %v1432_v2 = vpop.permute.xlu0 %1431 }
0x11ca   :  { %v1434_v3 = vmul.f32 %v2616_v63, %v1432_v2 }
0x11cc   :  { %1436 = vrot.lane.b32.xlu1 %v1434_v3, %s2698_s0 }
0x11de   :  { %v1540_v8 = vpop.permute.xlu0 %1539 }
0x11df   :  { %v1542_v9 = vmul.f32 %v2620_v7, %v1540_v8 }
0x11e1   :  { %1544 = vrot.lane.b32.xlu0 %v1542_v9, %s2698_s0 }
0x123e   :  { %v1437_v10 = vpop.permute.xlu1 %1436 }
0x123f   :  { %v1439_v11 = vadd.f32 %v1437_v10, %v2824_v14 }
0x1241   :  { %2621 = vtanh.f32 %v1439_v11 }
0x124b   :  { %v2622_v12 = vpop.eup %2621 }
0x124c   :  { %1443 = vrot.lane.b32.xlu1 %v2622_v12, %s2699_s3 }
0x1253   :  { %v1545_v13 = vpop.permute.xlu0 %1544 }
0x1254   :  { %v1547_v15 = vadd.f32 %v1545_v13, %v1529_v56 }
0x1256   :  { %2623 = vtanh.f32 %v1547_v15 }
0x1260   :  { %v2624_v17 = vpop.eup %2623 }
0x1261   :  { %1551 = vrot.lane.b32.xlu0 %v2624_v17, %s2699_s3 }
0x12be   :  { %v1444_v21 = vpop.permute.xlu1 %1443 }
0x12bf   :  { %v1446_v23 = vmul.f32 %v1444_v21, %v1441_v18 }
0x12c1   :  { %v3086_v24 = vadd.f32 %v1449_v22, %v1446_v23 }
0x12c3   :  { %v1558_v25 = vrot.slane %v3086_v24, 4  ;;  %v1662_v61 = vrot.slane %v3086_v24, 6 }
0x12c5   :  { %1559 = vrot.lane.b32.xlu1 %v1558_v25, %s2699_s3 }
0x12c9   :  { %1666 = vrot.lane.b32.xlu1 %v3086_v24, %s2699_s3 }
0x12d3   :  { %v1552_v26 = vpop.permute.xlu0 %1551 }
0x12d4   :  { %v1554_v29 = vmul.f32 %v1552_v26, %v1549_v27  ;;  %v1879_v27 = vld [vmem:[#allocation4] sm:$0xff] }
0x12d6   :  { %v1556_v31 = vadd.f32 %v1555_v30, %v1554_v29  ;;  %v1881_v29 = vld [vmem:[#allocation4 + $0x10] sm:$0xff]  ;;  %v1882_v30 = vld [vmem:[#allocation4 + $0x18] sm:$0xff] }
0x12d8   :  { %v1670_v36 = vrot.slane %v1556_v31, 4 }
0x1337   :  { %v1560_v28 = vpop.permute.xlu1 %1559 }
0x1338   :  { %2336 = vmatmul.mubr.msk.f32.vlgmr.msra.gmra.mrb[12].mxu1 %vm170_vm3, %v1560_v28  ;;  %v1880_v28 = vld [vmem:[#allocation4 + $0x8] sm:$0xff] }
0x1339   :  { %2509 = vmatpush3.bf16.msra.mxu1 %v2835_v33  ;;  %2354 = vmatprep.mubr.msk.f32.mxu1 %vm2696_vm0, %v2697_v1 }
0x133a   :  { %2510 = vmatprep.subr.bf16.mxu1 %v2695_v0 }
0x133b   :  { %v1667_v32 = vpop.permute.xlu1 %1666 }
0x133c   :  { %v1672_v33 = vsel %vm170_vm3, %v1667_v32, %v1670_v36 }
0x133d   :  { %2512 = vmatpush3.bf16.msra.mxu1 %v2838_v35  ;;  %v1674_v37 = vrot.slane %v1672_v33, 4 }
0x133e   :  { %2513 = vmatprep.subr.bf16.mxu1 %v2695_v0 }
0x1341   :  { %2515 = vmatpush3.bf16.msra.mxu1 %v2842_v38 }
0x1342   :  { %2516 = vmatprep.subr.bf16.mxu1 %v2695_v0 }
0x1345   :  { %2518 = vmatpush3.bf16.msra.mxu1 %v2847_v42 }
0x1346   :  { %2531 = vmatprep.subr.bf16.mxu1 %v2695_v0 }
0x1348   :  { %2355 = vmatmul.mubr.msk.f32.vlgmr.msra.gmra.mrb[14].mxu1 %vm395_vm4, %v1674_v37 }
0x1349   :  { %2384 = vmatprep.mubr.msk.f32.mxu1 %vm2696_vm0, %v2697_v1 }
0x140b   :  { %v1629_v35 = vpop.f32.mrb[12].mxu1 }
0x140c   :  { %v1643_v39 = vadd.f32 %v1629_v35, %v2826_v16  ;;  %v2337_v40 = vpop.f32.mrb[13].mxu1  ;;  %v1634_v42 = vrot.slane %v1629_v35, 2 }
0x140e   :  { %v1645_v41 = vrot.slane %v1643_v39, 2  ;;  %v1636_v45 = vadd.f32 %v1634_v42, %v2824_v14 }
0x1410   :  { %1646 = vrot.lane.b32.xlu0 %v1645_v41, %s2698_s0  ;;  %v2004_v46 = vmul.f32 -1.442695, %v1636_v45  ;;  %v2009_v41 = vld [vmem:[%s3143_s8] ss:$0 sm:$0xff] }
0x1412   :  { %2625 = vpow2.f32 %v2004_v46 }
0x141b   :  { %v1743_v38 = vpop.f32.mrb[14].mxu1 }
0x141c   :  { %v1744_v43 = vadd.f32 %v2876_v6, %v1743_v38  ;;  %v2356_v44 = vpop.f32.mrb[15].mxu1  ;;  %v2626_v34 = vpop.eup %2625 }
0x141d   :  { %v1640_v47 = vadd.f32 1.0, %v2626_v34 }
0x141e   :  { %1754 = vrot.lane.b32.xlu1 %v1744_v43, %s2700_s29  ;;  %v2006_v1 = vmul.f32 -1.442695, %v1744_v43 }
0x1420   :  { %2627 = vpow2.f32 %v2006_v1 }
0x1421   :  { %2629 = vrcp.f32 %v1640_v47 }
0x142a   :  { %v2628_v16 = vpop.eup %2627 }
0x142b   :  { %v2630_v48 = vpop.eup %2629  ;;  %v1750_v49 = vadd.f32 1.0, %v2628_v16 }
0x142c   :  { %v1656_v60 = vsub.f32 1.0, %v2630_v48  ;;  %v1664_v63 = vmul.f32 %v2630_v48, %v1662_v61 }
0x142d   :  { %2631 = vrcp.f32 %v1750_v49 }
0x1437   :  { %v2632_v52 = vpop.eup %2631 }
0x1438   :  { %v1764_v4 = vsub.f32 1.0, %v2632_v52  ;;  %v1770_v7 = vmul.f32 %v2632_v52, %v1556_v31  ;;  %v2535_v31 = vpack.c.bf16 %v1882_v30, %v1881_v29 }
0x1482   :  { %v1647_v50 = vpop.permute.xlu0 %1646 }
0x1483   :  { %v1649_v51 = vmul.f32 %v2630_v48, %v1647_v50 }
0x1485   :  { %1651 = vrot.lane.b32.xlu0 %v1649_v51, %s2698_s0 }
0x1490   :  { %v1755_v53 = vpop.permute.xlu1 %1754 }
0x1491   :  { %v1757_v54 = vmul.f32 %v2632_v52, %v1755_v53 }
0x1493   :  { %1759 = vrot.lane.b32.xlu1 %v1757_v54, %s2698_s0 }
0x14f7   :  { %v1652_v55 = vpop.permute.xlu0 %1651 }
0x14f8   :  { %v1654_v56 = vadd.f32 %v1652_v55, %v2824_v14 }
0x14fa   :  { %2633 = vtanh.f32 %v1654_v56 }
0x1504   :  { %v2634_v57 = vpop.eup %2633 }
0x1505   :  { %v1760_v20 = vpop.permute.xlu1 %1759  ;;  %1658 = vrot.lane.b32.xlu0 %v2634_v57, %s2699_s3 }
0x1506   :  { %v1762_v58 = vadd.f32 %v1760_v20, %v1744_v43 }
0x1508   :  { %2635 = vtanh.f32 %v1762_v58 }
0x1512   :  { %v2636_v59 = vpop.eup %2635 }
0x1513   :  { %1766 = vrot.lane.b32.xlu1 %v2636_v59, %s2699_s3 }
0x1577   :  { %v1659_v62 = vpop.permute.xlu0 %1658 }
0x1578   :  { %v1661_v2 = vmul.f32 %v1659_v62, %v1656_v60 }
0x157a   :  { %v1665_v3 = vadd.f32 %v1664_v63, %v1661_v2 }
0x157c   :  { %1773 = vrot.lane.b32.xlu0 %v1665_v3, %s2699_s3 }
0x1585   :  { %v1767_v14 = vpop.permute.xlu1 %1766 }
0x1586   :  { %v1769_v5 = vmul.f32 %v1767_v14, %v1764_v4 }
0x1588   :  { %v1771_v8 = vadd.f32 %v1770_v7, %v1769_v5 }
0x158a   :  { %v1777_v9 = vrot.slane %v1771_v8, 2 }
0x15ee   :  { %v1774_v10 = vpop.permute.xlu0 %1773 }
0x15ef   :  { %v1779_v11 = vsel %vm170_vm3, %v1774_v10, %v1777_v9 }
0x15f0   :  { %v1781_v12 = vrot.slane %v1779_v11, 6 }
0x15f2   :  { %2374 = vmatmul.mubr.msk.f32.vlgmr.msra.gmra.mrb[16].mxu0 %vm395_vm4, %v1781_v12 }
0x16c5   :  { %v1850_v13 = vpop.f32.mrb[16].mxu0 }
0x16c6   :  { %v1851_v15 = vadd.f32 %v2876_v6, %v1850_v13  ;;  %v2375_v17 = vpop.f32.mrb[17].mxu0  ;;  %v2532_v6 = vpack.c.bf16 %v1880_v28, %v1879_v27 }
0x16c8   :  { %1861 = vrot.lane.b32.xlu1 %v1851_v15, %s2700_s29  ;;  %v2008_v18 = vmul.f32 -1.442695, %v1851_v15  ;;  %2533 = vmatpush3.bf16.msra.mxu1 %v2532_v6 }
0x16c9   :  { %2534 = vmatprep.subr.bf16.mxu1 %v2695_v0 }
0x16ca   :  { %2637 = vpow2.f32 %v2008_v18 }
0x16cc   :  { %2536 = vmatpush3.bf16.msra.mxu1 %v2535_v31 }
0x16d4   :  { %v2638_v19 = vpop.eup %2637 }
0x16d5   :  { %v1857_v21 = vadd.f32 1.0, %v2638_v19 }
0x16d7   :  { %2639 = vrcp.f32 %v1857_v21 }
0x16e1   :  { %v2640_v22 = vpop.eup %2639 }
0x16e2   :  { %v1871_v36 = vsub.f32 1.0, %v2640_v22  ;;  %v1877_v37 = vmul.f32 %v2640_v22, %v1771_v8 }
0x173a   :  { %v1862_v23 = vpop.permute.xlu1 %1861 }
0x173b   :  { %v1864_v24 = vmul.f32 %v2640_v22, %v1862_v23 }
0x173d   :  { %1866 = vrot.lane.b32.xlu0 %v1864_v24, %s2698_s0 }
0x17af   :  { %v1867_v25 = vpop.permute.xlu0 %1866 }
0x17b0   :  { %v1869_v26 = vadd.f32 %v1867_v25, %v1851_v15 }
0x17b2   :  { %2641 = vtanh.f32 %v1869_v26 }
0x17bc   :  { %v2642_v32 = vpop.eup %2641 }
0x17bd   :  { %1873 = vrot.lane.b32.xlu1 %v2642_v32, %s2699_s3 }
0x182f   :  { %v1874_v33 = vpop.permute.xlu1 %1873 }
0x1830   :  { %v1876_v35 = vmul.f32 %v1874_v33, %v1871_v36 }
0x1832   :  { %v1878_v39 = vadd.f32 %v1877_v37, %v1876_v35 }
0x1834   :  { %1891 = vrot.lane.b32.xlu0 %v1878_v39, %s2699_s3 }
0x18a6   :  { %v1892_v40 = vpop.permute.xlu0 %1891 }
0x18a7   :  { %2385 = vmatmul.mubr.msk.f32.vlgmr.msra.gmra.mrb[16].mxu1 %vm170_vm3, %v1892_v40 }
0x197a   :  { %v1961_v38 = vpop.f32.mrb[16].mxu1 }
0x197b   :  { %v1962_v0 = vadd.f32 %v2009_v41, %v1961_v38  ;;  %v2386_v43 = vpop.f32.mrb[17].mxu1 }
0x197d   :  { %1965 = vst [vmem:[%s3144_s9] sm:$0x3] %v1962_v0 }
0x197e   :  { %1970 = vsyncpa [#allocation3], 1 }
0x197f   :  { %1971 = vsyncpa [#allocation5], 1 }

</bundles_post_ra>
